<compile_context>
chip_gen: v7x
topology: tpu7x:2x2x1
jax: 0.10.0
libtpu: 0.0.40
codegen_flags: <defaults>
</compile_context>

<pallas_src>
import functools

import jax
import jax.numpy as jnp
from jax.experimental import pallas as pl
from jax.experimental.pallas import tpu as pltpu


_TM = 256                         # output-row tile
_TK = 512                         # reduction (K) tile
_LANE = 128                       # lane width; latent dim is padded to this
_VMEM_LIMIT = 48 * 1024 * 1024    # explicit scoped-VMEM budget (fits v7x's 64 MiB)


def _round_up(x, m):
    return ((x + m - 1) // m) * m


# ---------------------------------------------------------------------------
# Kernels
# ---------------------------------------------------------------------------
def _matmul_acc_kernel(a_ref, b_ref, add_ref, cur_ref, acc_ref, acc_sc):
    """One propagation layer tile: cur_out = A @ B ; acc_out = add + A @ B."""
    k = pl.program_id(1)

    @pl.when(k == 0)
    def _init():
        acc_sc[...] = jnp.zeros_like(acc_sc)

    acc_sc[...] += jnp.dot(a_ref[...], b_ref[...],
                           preferred_element_type=jnp.float32)

    @pl.when(k == pl.num_programs(1) - 1)
    def _finalize():
        cur_ref[...] = acc_sc[...].astype(cur_ref.dtype)
        acc_ref[...] = (add_ref[...] + acc_sc[...]).astype(acc_ref.dtype)


def _matmul_kernel(a_ref, b_ref, out_ref, acc_sc):
    """Plain tiled matmul with K-reduction accumulator (users = G_UI @ items)."""
    k = pl.program_id(1)

    @pl.when(k == 0)
    def _init():
        acc_sc[...] = jnp.zeros_like(acc_sc)

    acc_sc[...] += jnp.dot(a_ref[...], b_ref[...],
                           preferred_element_type=jnp.float32)

    @pl.when(k == pl.num_programs(1) - 1)
    def _finalize():
        out_ref[...] = acc_sc[...].astype(out_ref.dtype)


# ---------------------------------------------------------------------------
# pallas_call wrappers
# ---------------------------------------------------------------------------
def _compiler_params():
    return pltpu.CompilerParams(
        dimension_semantics=("parallel", "arbitrary"),
        vmem_limit_bytes=_VMEM_LIMIT,
    )


def _layer_step(g, cur, acc, *, tm=_TM, tk=_TK):
    """(cur_next, acc_next) = (G @ cur, acc + G @ cur). Shapes are tile-aligned."""
    m, kk = g.shape
    d = cur.shape[1]
    grid = (m // tm, kk // tk)
    cost = pl.CostEstimate(
        flops=2 * m * kk * d,
        transcendentals=0,
        bytes_accessed=int(m * kk * g.dtype.itemsize
                           + kk * d * cur.dtype.itemsize
                           + m * d * (4 + 4 + cur.dtype.itemsize)),
    )
    return pl.pallas_call(
        _matmul_acc_kernel,
        out_shape=(
            jax.ShapeDtypeStruct((m, d), cur.dtype),     # cur_next (MXU dtype)
            jax.ShapeDtypeStruct((m, d), jnp.float32),   # running layer sum (f32)
        ),
        grid_spec=pltpu.PrefetchScalarGridSpec(
            num_scalar_prefetch=0,
            grid=grid,
            in_specs=[
                pl.BlockSpec((tm, tk), lambda i, k: (i, k)),   # graph tile
                pl.BlockSpec((tk, d), lambda i, k: (k, 0)),    # cur K-slab
                pl.BlockSpec((tm, d), lambda i, k: (i, 0)),    # acc (read at last k)
            ],
            out_specs=(
                pl.BlockSpec((tm, d), lambda i, k: (i, 0)),
                pl.BlockSpec((tm, d), lambda i, k: (i, 0)),
            ),
            scratch_shapes=[pltpu.VMEM((tm, d), jnp.float32)],
        ),
        compiler_params=_compiler_params(),
        cost_estimate=cost,
    )(g, cur, acc)


def _project(g, x, *, tm=_TM, tk=_TK):
    """users = G_UI @ items, same tiled K-reduction structure."""
    m, kk = g.shape
    d = x.shape[1]
    grid = (m // tm, kk // tk)
    cost = pl.CostEstimate(
        flops=2 * m * kk * d,
        transcendentals=0,
        bytes_accessed=int(m * kk * g.dtype.itemsize
                           + kk * d * x.dtype.itemsize
                           + m * d * 4),
    )
    return pl.pallas_call(
        _matmul_kernel,
        out_shape=jax.ShapeDtypeStruct((m, d), jnp.float32),
        grid_spec=pltpu.PrefetchScalarGridSpec(
            num_scalar_prefetch=0,
            grid=grid,
            in_specs=[
                pl.BlockSpec((tm, tk), lambda i, k: (i, k)),
                pl.BlockSpec((tk, d), lambda i, k: (k, 0)),
            ],
            out_specs=pl.BlockSpec((tm, d), lambda i, k: (i, 0)),
            scratch_shapes=[pltpu.VMEM((tm, d), jnp.float32)],
        ),
        compiler_params=_compiler_params(),
        cost_estimate=cost,
    )(g, x)


# ---------------------------------------------------------------------------
# LightGCN computer() / forward()
# ---------------------------------------------------------------------------
def lightgcn_computer(g_i2, g_ui, item_emb, n_layers, *,
                      compute_dtype=jnp.bfloat16):
    num_items, d = item_emb.shape
    num_users = g_ui.shape[0]

    d_pad = _round_up(d, _LANE)
    i_pad = _round_up(num_items, max(_TM, _TK))
    u_pad = _round_up(num_users, _TM)

    # Zero-padding is exact for these matmuls (padded rows/cols contribute 0).
    emb_p = jnp.zeros((i_pad, d_pad), jnp.float32).at[:num_items, :d].set(item_emb)
    g_i2_p = jnp.zeros((i_pad, i_pad), compute_dtype).at[
        :num_items, :num_items].set(g_i2.astype(compute_dtype))
    g_ui_p = jnp.zeros((u_pad, i_pad), compute_dtype).at[
        :num_users, :num_items].set(g_ui.astype(compute_dtype))

    cur = emb_p.astype(compute_dtype)   # layer-0 embeddings, MXU dtype
    acc = emb_p                         # f32 running sum of layer outputs
    for _ in range(n_layers):
        cur, acc = _layer_step(g_i2_p, cur, acc)

    items_p = acc * (1.0 / float(n_layers + 1))          # mean over layers (f32)
    users_p = _project(g_ui_p, items_p.astype(compute_dtype))

    return users_p[:num_users, :d], items_p[:num_items, :d]


def lightgcn_forward(g_i2, g_ui, item_emb, users_idx, items_idx, n_layers, *,
                     compute_dtype=jnp.bfloat16):
    users_all, items_all = lightgcn_computer(
        g_i2, g_ui, item_emb, n_layers, compute_dtype=compute_dtype)
    # Embedding lookups + tiny batched dot-reduce: plain JAX (XLA fuses them;
    # a Pallas call at this size is pure launch overhead + masked 1-D stores).
    users_emb = users_all[users_idx]
    items_emb = items_all[items_idx]
    return jnp.sum(users_emb * items_emb, axis=1)


def _reference_forward(g_i2, g_ui, item_emb, users_idx, items_idx, n_layers):
    embs = [item_emb]
    cur = item_emb
    for _ in range(n_layers):
        cur = g_i2 @ cur
        embs.append(cur)
    items = jnp.mean(jnp.stack(embs, axis=1), axis=1)
    users = g_ui @ items
    return jnp.sum(users[users_idx] * items[items_idx], axis=1)


if __name__ == "__main__":
    key = jax.random.PRNGKey(0)
    k_emb, k_gi2, k_gui, k_u, k_i = jax.random.split(key, 5)

    # small synthetic shapes consistent with the module
    num_items = 64
    num_users = 48
    latent_dim = 32
    n_layers = 3
    batch = 8

    # embedding_item weight ~ Normal(0, 0.1)  (pretrain == 0 path)
    item_emb = 0.1 * jax.random.normal(k_emb, (num_items, latent_dim), jnp.float32)

    # synthetic (dense stand-in) normalized adjacency graphs, deterministic
    g_i2 = jax.random.uniform(k_gi2, (num_items, num_items), jnp.float32)
    g_i2 = jnp.where(g_i2 > 0.9, g_i2, 0.0)                       # sparsify
    g_i2 = g_i2 / (jnp.sum(g_i2, axis=1, keepdims=True) + 1e-6)   # row-normalize

    g_ui = jax.random.uniform(k_gui, (num_users, num_items), jnp.float32)
    g_ui = jnp.where(g_ui > 0.9, g_ui, 0.0)
    g_ui = g_ui / (jnp.sum(g_ui, axis=1, keepdims=True) + 1e-6)

    users_idx = jax.random.randint(k_u, (batch,), 0, num_users)
    items_idx = jax.random.randint(k_i, (batch,), 0, num_items)

    fwd = jax.jit(functools.partial(lightgcn_forward, n_layers=n_layers))
    gamma = jax.block_until_ready(fwd(g_i2, g_ui, item_emb, users_idx, items_idx))

    ref = _reference_forward(g_i2, g_ui, item_emb, users_idx, items_idx, n_layers)
    assert gamma.shape == (batch,)
    # bf16 MXU inputs with f32 accumulation vs a pure-f32 reference
    assert jnp.allclose(gamma, ref, atol=5e-3, rtol=5e-2), (
        f"max abs err {float(jnp.max(jnp.abs(gamma - ref)))}")

    print("KERNEL_OK")
</pallas_src>

<mosaic_0001>
module attributes {stable_mosaic.version = 11 : i64} {
  func.func @_matmul_acc_kernel(%arg0: i32, %arg1: i32, %arg2: memref<256x512xbf16, #tpu.memory_space<vmem>>, %arg3: memref<512x128xbf16, #tpu.memory_space<vmem>>, %arg4: memref<256x128xf32, #tpu.memory_space<vmem>>, %arg5: memref<256x128xbf16, #tpu.memory_space<vmem>>, %arg6: memref<256x128xf32, #tpu.memory_space<vmem>>, %arg7: memref<256x128xf32, #tpu.memory_space<vmem>>) attributes {dimension_semantics = [#tpu.dimension_semantics<parallel>, #tpu.dimension_semantics<arbitrary>], iteration_bounds = array<i64: 2, 1>, scalar_prefetch = 0 : i64, scratch_operands = 1 : i64, tpu.core_type = #tpu.core_type<tc>, window_params = [{transform_indices = @transform_0, window_bounds = array<i64: 256, 512>}, {transform_indices = @transform_1, window_bounds = array<i64: 512, 128>}, {transform_indices = @transform_2, window_bounds = array<i64: 256, 128>}, {transform_indices = @transform_3, window_bounds = array<i64: 256, 128>}, {transform_indices = @transform_4, window_bounds = array<i64: 256, 128>}]} {
    %c0_i32 = arith.constant 0 : i32
    %0 = arith.cmpi eq, %arg1, %c0_i32 : i32
    %1 = arith.extui %0 : i1 to i32
    %c0_i32_0 = arith.constant 0 : i32
    %2 = arith.cmpi ne, %1, %c0_i32_0 : i32
    scf.if %2 {
      %cst_10 = arith.constant 0.000000e+00 : f32
      %12 = vector.broadcast %cst_10 : f32 to vector<256x128xf32>
      %c0_11 = arith.constant 0 : index
      %c0_12 = arith.constant 0 : index
      %13 = vector.load %arg7[%c0_11, %c0_12] : memref<256x128xf32, #tpu.memory_space<vmem>>, vector<256x128xf32>
      tpu.vector_store %arg7[%c0_11, %c0_12], %12 {strides = array<i32>} : memref<256x128xf32, #tpu.memory_space<vmem>>, vector<256x128xf32>,
    } else {
    }
    %c0 = arith.constant 0 : index
    %c0_1 = arith.constant 0 : index
    %3 = vector.load %arg7[%c0, %c0_1] : memref<256x128xf32, #tpu.memory_space<vmem>>, vector<256x128xf32>
    %c0_2 = arith.constant 0 : index
    %c0_3 = arith.constant 0 : index
    %4 = vector.load %arg2[%c0_2, %c0_3] : memref<256x512xbf16, #tpu.memory_space<vmem>>, vector<256x512xbf16>
    %c0_4 = arith.constant 0 : index
    %c0_5 = arith.constant 0 : index
    %5 = vector.load %arg3[%c0_4, %c0_5] : memref<512x128xbf16, #tpu.memory_space<vmem>>, vector<512x128xbf16>
    %cst = arith.constant dense<0.000000e+00> : vector<256x128xf32>
    %6 = tpu.matmul %4, %5, %cst {dimension_numbers = #tpu.dot_dimension_numbers<[1], [0], [0], [1], [0, 0, 1, 1], [], []>} : vector<256x512xbf16>, vector<512x128xbf16>, vector<256x128xf32> -> vector<256x128xf32>
    %7 = arith.addf %3, %6 : vector<256x128xf32>
    %c0_6 = arith.constant 0 : index
    %c0_7 = arith.constant 0 : index
    %8 = vector.load %arg7[%c0_6, %c0_7] : memref<256x128xf32, #tpu.memory_space<vmem>>, vector<256x128xf32>
    tpu.vector_store %arg7[%c0_6, %c0_7], %7 {strides = array<i32>} : memref<256x128xf32, #tpu.memory_space<vmem>>, vector<256x128xf32>,
    %c0_i32_8 = arith.constant 0 : i32
    %9 = arith.cmpi eq, %arg1, %c0_i32_8 : i32
    %10 = arith.extui %9 : i1 to i32
    %c0_i32_9 = arith.constant 0 : i32
    %11 = arith.cmpi ne, %10, %c0_i32_9 : i32
    scf.if %11 {
      %c0_10 = arith.constant 0 : index
      %c0_11 = arith.constant 0 : index
      %12 = vector.load %arg7[%c0_10, %c0_11] : memref<256x128xf32, #tpu.memory_space<vmem>>, vector<256x128xf32>
      %13 = arith.truncf %12 : vector<256x128xf32> to vector<256x128xbf16>
      %c0_12 = arith.constant 0 : index
      %c0_13 = arith.constant 0 : index
      %14 = vector.load %arg5[%c0_12, %c0_13] : memref<256x128xbf16, #tpu.memory_space<vmem>>, vector<256x128xbf16>
      tpu.vector_store %arg5[%c0_12, %c0_13], %13 {strides = array<i32>} : memref<256x128xbf16, #tpu.memory_space<vmem>>, vector<256x128xbf16>,
      %c0_14 = arith.constant 0 : index
      %c0_15 = arith.constant 0 : index
      %15 = vector.load %arg4[%c0_14, %c0_15] : memref<256x128xf32, #tpu.memory_space<vmem>>, vector<256x128xf32>
      %c0_16 = arith.constant 0 : index
      %c0_17 = arith.constant 0 : index
      %16 = vector.load %arg7[%c0_16, %c0_17] : memref<256x128xf32, #tpu.memory_space<vmem>>, vector<256x128xf32>
      %17 = arith.addf %15, %16 : vector<256x128xf32>
      %c0_18 = arith.constant 0 : index
      %c0_19 = arith.constant 0 : index
      %18 = vector.load %arg6[%c0_18, %c0_19] : memref<256x128xf32, #tpu.memory_space<vmem>>, vector<256x128xf32>
      tpu.vector_store %arg6[%c0_18, %c0_19], %17 {strides = array<i32>} : memref<256x128xf32, #tpu.memory_space<vmem>>, vector<256x128xf32>,
    } else {
    }
    return
  }
  func.func @transform_0(%arg0: i32, %arg1: i32) -> (i32, i32) {
    %c0_i32 = arith.constant 0 : i32
    return %arg0, %arg1 : i32, i32
  }
  func.func @transform_1(%arg0: i32, %arg1: i32) -> (i32, i32) {
    %c0_i32 = arith.constant 0 : i32
    %c0_i32_0 = arith.constant 0 : i32
    return %arg1, %c0_i32 : i32, i32
  }
  func.func @transform_2(%arg0: i32, %arg1: i32) -> (i32, i32) {
    %c0_i32 = arith.constant 0 : i32
    %c0_i32_0 = arith.constant 0 : i32
    return %arg0, %c0_i32 : i32, i32
  }
  func.func @transform_3(%arg0: i32, %arg1: i32) -> (i32, i32) {
    %c0_i32 = arith.constant 0 : i32
    %c0_i32_0 = arith.constant 0 : i32
    return %arg0, %c0_i32 : i32, i32
  }
  func.func @transform_4(%arg0: i32, %arg1: i32) -> (i32, i32) {
    %c0_i32 = arith.constant 0 : i32
    %c0_i32_0 = arith.constant 0 : i32
    return %arg0, %c0_i32 : i32, i32
  }
}

module attributes {stable_mosaic.version = 11 : i64} {
  func.func @_matmul_acc_kernel(%arg0: i32, %arg1: i32, %arg2: memref<256x512xbf16, #tpu.memory_space<vmem>>, %arg3: memref<512x128xbf16, #tpu.memory_space<vmem>>, %arg4: memref<256x128xf32, #tpu.memory_space<vmem>>, %arg5: memref<256x128xbf16, #tpu.memory_space<vmem>>, %arg6: memref<256x128xf32, #tpu.memory_space<vmem>>, %arg7: memref<256x128xf32, #tpu.memory_space<vmem>>) attributes {dimension_semantics = [#tpu.dimension_semantics<parallel>, #tpu.dimension_semantics<arbitrary>], iteration_bounds = array<i64: 2, 1>, scalar_prefetch = 0 : i64, scratch_operands = 1 : i64, tpu.core_type = #tpu.core_type<tc>, window_params = [{transform_indices = @transform_0, window_bounds = array<i64: 256, 512>}, {transform_indices = @transform_1, window_bounds = array<i64: 512, 128>}, {transform_indices = @transform_2, window_bounds = array<i64: 256, 128>}, {transform_indices = @transform_3, window_bounds = array<i64: 256, 128>}, {transform_indices = @transform_4, window_bounds = array<i64: 256, 128>}]} {
    %c0_i32 = arith.constant 0 : i32
    %0 = arith.cmpi eq, %arg1, %c0_i32 : i32
    %1 = arith.extui %0 : i1 to i32
    %c0_i32_0 = arith.constant 0 : i32
    %2 = arith.cmpi ne, %1, %c0_i32_0 : i32
    scf.if %2 {
      %cst_10 = arith.constant 0.000000e+00 : f32
      %12 = vector.broadcast %cst_10 : f32 to vector<256x128xf32>
      %c0_11 = arith.constant 0 : index
      %c0_12 = arith.constant 0 : index
      %13 = vector.load %arg7[%c0_11, %c0_12] : memref<256x128xf32, #tpu.memory_space<vmem>>, vector<256x128xf32>
      tpu.vector_store %arg7[%c0_11, %c0_12], %12 {strides = array<i32>} : memref<256x128xf32, #tpu.memory_space<vmem>>, vector<256x128xf32>,
    } else {
    }
    %c0 = arith.constant 0 : index
    %c0_1 = arith.constant 0 : index
    %3 = vector.load %arg7[%c0, %c0_1] : memref<256x128xf32, #tpu.memory_space<vmem>>, vector<256x128xf32>
    %c0_2 = arith.constant 0 : index
    %c0_3 = arith.constant 0 : index
    %4 = vector.load %arg2[%c0_2, %c0_3] : memref<256x512xbf16, #tpu.memory_space<vmem>>, vector<256x512xbf16>
    %c0_4 = arith.constant 0 : index
    %c0_5 = arith.constant 0 : index
    %5 = vector.load %arg3[%c0_4, %c0_5] : memref<512x128xbf16, #tpu.memory_space<vmem>>, vector<512x128xbf16>
    %cst = arith.constant dense<0.000000e+00> : vector<256x128xf32>
    %6 = tpu.matmul %4, %5, %cst {dimension_numbers = #tpu.dot_dimension_numbers<[1], [0], [0], [1], [0, 0, 1, 1], [], []>} : vector<256x512xbf16>, vector<512x128xbf16>, vector<256x128xf32> -> vector<256x128xf32>
    %7 = arith.addf %3, %6 : vector<256x128xf32>
    %c0_6 = arith.constant 0 : index
    %c0_7 = arith.constant 0 : index
    %8 = vector.load %arg7[%c0_6, %c0_7] : memref<256x128xf32, #tpu.memory_space<vmem>>, vector<256x128xf32>
    tpu.vector_store %arg7[%c0_6, %c0_7], %7 {strides = array<i32>} : memref<256x128xf32, #tpu.memory_space<vmem>>, vector<256x128xf32>,
    %c0_i32_8 = arith.constant 0 : i32
    %9 = arith.cmpi eq, %arg1, %c0_i32_8 : i32
    %10 = arith.extui %9 : i1 to i32
    %c0_i32_9 = arith.constant 0 : i32
    %11 = arith.cmpi ne, %10, %c0_i32_9 : i32
    scf.if %11 {
      %c0_10 = arith.constant 0 : index
      %c0_11 = arith.constant 0 : index
      %12 = vector.load %arg7[%c0_10, %c0_11] : memref<256x128xf32, #tpu.memory_space<vmem>>, vector<256x128xf32>
      %13 = arith.truncf %12 : vector<256x128xf32> to vector<256x128xbf16>
      %c0_12 = arith.constant 0 : index
      %c0_13 = arith.constant 0 : index
      %14 = vector.load %arg5[%c0_12, %c0_13] : memref<256x128xbf16, #tpu.memory_space<vmem>>, vector<256x128xbf16>
      tpu.vector_store %arg5[%c0_12, %c0_13], %13 {strides = array<i32>} : memref<256x128xbf16, #tpu.memory_space<vmem>>, vector<256x128xbf16>,
      %c0_14 = arith.constant 0 : index
      %c0_15 = arith.constant 0 : index
      %15 = vector.load %arg4[%c0_14, %c0_15] : memref<256x128xf32, #tpu.memory_space<vmem>>, vector<256x128xf32>
      %c0_16 = arith.constant 0 : index
      %c0_17 = arith.constant 0 : index
      %16 = vector.load %arg7[%c0_16, %c0_17] : memref<256x128xf32, #tpu.memory_space<vmem>>, vector<256x128xf32>
      %17 = arith.addf %15, %16 : vector<256x128xf32>
      %c0_18 = arith.constant 0 : index
      %c0_19 = arith.constant 0 : index
      %18 = vector.load %arg6[%c0_18, %c0_19] : memref<256x128xf32, #tpu.memory_space<vmem>>, vector<256x128xf32>
      tpu.vector_store %arg6[%c0_18, %c0_19], %17 {strides = array<i32>} : memref<256x128xf32, #tpu.memory_space<vmem>>, vector<256x128xf32>,
    } else {
    }
    return
  }
  func.func @transform_0(%arg0: i32, %arg1: i32) -> (i32, i32) {
    %c0_i32 = arith.constant 0 : i32
    return %arg0, %arg1 : i32, i32
  }
  func.func @transform_1(%arg0: i32, %arg1: i32) -> (i32, i32) {
    %c0_i32 = arith.constant 0 : i32
    %c0_i32_0 = arith.constant 0 : i32
    return %arg1, %c0_i32 : i32, i32
  }
  func.func @transform_2(%arg0: i32, %arg1: i32) -> (i32, i32) {
    %c0_i32 = arith.constant 0 : i32
    %c0_i32_0 = arith.constant 0 : i32
    return %arg0, %c0_i32 : i32, i32
  }
  func.func @transform_3(%arg0: i32, %arg1: i32) -> (i32, i32) {
    %c0_i32 = arith.constant 0 : i32
    %c0_i32_0 = arith.constant 0 : i32
    return %arg0, %c0_i32 : i32, i32
  }
  func.func @transform_4(%arg0: i32, %arg1: i32) -> (i32, i32) {
    %c0_i32 = arith.constant 0 : i32
    %c0_i32_0 = arith.constant 0 : i32
    return %arg0, %c0_i32 : i32, i32
  }
}

module attributes {stable_mosaic.version = 11 : i64} {
  func.func @_matmul_kernel(%arg0: i32, %arg1: i32, %arg2: memref<256x512xbf16, #tpu.memory_space<vmem>>, %arg3: memref<512x128xbf16, #tpu.memory_space<vmem>>, %arg4: memref<256x128xf32, #tpu.memory_space<vmem>>, %arg5: memref<256x128xf32, #tpu.memory_space<vmem>>) attributes {dimension_semantics = [#tpu.dimension_semantics<parallel>, #tpu.dimension_semantics<arbitrary>], iteration_bounds = array<i64: 1, 1>, scalar_prefetch = 0 : i64, scratch_operands = 1 : i64, tpu.core_type = #tpu.core_type<tc>, window_params = [{transform_indices = @transform_0, window_bounds = array<i64: 256, 512>}, {transform_indices = @transform_1, window_bounds = array<i64: 512, 128>}, {transform_indices = @transform_2, window_bounds = array<i64: 256, 128>}]} {
    %c0_i32 = arith.constant 0 : i32
    %0 = arith.cmpi eq, %arg1, %c0_i32 : i32
    %1 = arith.extui %0 : i1 to i32
    %c0_i32_0 = arith.constant 0 : i32
    %2 = arith.cmpi ne, %1, %c0_i32_0 : i32
    scf.if %2 {
      %cst_10 = arith.constant 0.000000e+00 : f32
      %12 = vector.broadcast %cst_10 : f32 to vector<256x128xf32>
      %c0_11 = arith.constant 0 : index
      %c0_12 = arith.constant 0 : index
      %13 = vector.load %arg5[%c0_11, %c0_12] : memref<256x128xf32, #tpu.memory_space<vmem>>, vector<256x128xf32>
      tpu.vector_store %arg5[%c0_11, %c0_12], %12 {strides = array<i32>} : memref<256x128xf32, #tpu.memory_space<vmem>>, vector<256x128xf32>,
    } else {
    }
    %c0 = arith.constant 0 : index
    %c0_1 = arith.constant 0 : index
    %3 = vector.load %arg5[%c0, %c0_1] : memref<256x128xf32, #tpu.memory_space<vmem>>, vector<256x128xf32>
    %c0_2 = arith.constant 0 : index
    %c0_3 = arith.constant 0 : index
    %4 = vector.load %arg2[%c0_2, %c0_3] : memref<256x512xbf16, #tpu.memory_space<vmem>>, vector<256x512xbf16>
    %c0_4 = arith.constant 0 : index
    %c0_5 = arith.constant 0 : index
    %5 = vector.load %arg3[%c0_4, %c0_5] : memref<512x128xbf16, #tpu.memory_space<vmem>>, vector<512x128xbf16>
    %cst = arith.constant dense<0.000000e+00> : vector<256x128xf32>
    %6 = tpu.matmul %4, %5, %cst {dimension_numbers = #tpu.dot_dimension_numbers<[1], [0], [0], [1], [0, 0, 1, 1], [], []>} : vector<256x512xbf16>, vector<512x128xbf16>, vector<256x128xf32> -> vector<256x128xf32>
    %7 = arith.addf %3, %6 : vector<256x128xf32>
    %c0_6 = arith.constant 0 : index
    %c0_7 = arith.constant 0 : index
    %8 = vector.load %arg5[%c0_6, %c0_7] : memref<256x128xf32, #tpu.memory_space<vmem>>, vector<256x128xf32>
    tpu.vector_store %arg5[%c0_6, %c0_7], %7 {strides = array<i32>} : memref<256x128xf32, #tpu.memory_space<vmem>>, vector<256x128xf32>,
    %c0_i32_8 = arith.constant 0 : i32
    %9 = arith.cmpi eq, %arg1, %c0_i32_8 : i32
    %10 = arith.extui %9 : i1 to i32
    %c0_i32_9 = arith.constant 0 : i32
    %11 = arith.cmpi ne, %10, %c0_i32_9 : i32
    scf.if %11 {
      %c0_10 = arith.constant 0 : index
      %c0_11 = arith.constant 0 : index
      %12 = vector.load %arg5[%c0_10, %c0_11] : memref<256x128xf32, #tpu.memory_space<vmem>>, vector<256x128xf32>
      %c0_12 = arith.constant 0 : index
      %c0_13 = arith.constant 0 : index
      %13 = vector.load %arg4[%c0_12, %c0_13] : memref<256x128xf32, #tpu.memory_space<vmem>>, vector<256x128xf32>
      tpu.vector_store %arg4[%c0_12, %c0_13], %12 {strides = array<i32>} : memref<256x128xf32, #tpu.memory_space<vmem>>, vector<256x128xf32>,
    } else {
    }
    return
  }
  func.func @transform_0(%arg0: i32, %arg1: i32) -> (i32, i32) {
    %c0_i32 = arith.constant 0 : i32
    return %arg0, %arg1 : i32, i32
  }
  func.func @transform_1(%arg0: i32, %arg1: i32) -> (i32, i32) {
    %c0_i32 = arith.constant 0 : i32
    %c0_i32_0 = arith.constant 0 : i32
    return %arg1, %c0_i32 : i32, i32
  }
  func.func @transform_2(%arg0: i32, %arg1: i32) -> (i32, i32) {
    %c0_i32 = arith.constant 0 : i32
    %c0_i32_0 = arith.constant 0 : i32
    return %arg0, %c0_i32 : i32, i32
  }
}

</mosaic_0001>

<bundles_post_ra>
// kernel: lightgcn_forward.4
= control target key start
LH: loop header
LB: loop body
LE: loop exit
PB: predicated region body
PF: predicated region fallthrough
CT: control target
= control target key end

     0   :  { %s2538_s15 = smov 0   ;;  %s2540_s16 = smov 0   ;;  %s2833_s0 = inlined_call_operand.vmem [shape: bf16[512,512], index: 0, kind: input, shape index: {}]   ;;  %s2834_s1 = inlined_call_operand.vmem [shape: bf16[512,128], index: 1, kind: input, shape index: {}]   ;;  %s2835_s2 = inlined_call_operand.vmem [shape: f32[512,128], index: 2, kind: input, shape index: {}]   ;;  %s2836_s3 = inlined_call_operand.vmem [shape: bf16[512,128], index: 3, kind: output, shape index: {0}]   ;;  %s2837_s4 = inlined_call_operand.vmem [shape: f32[512,128], index: 4, kind: output, shape index: {1}]  }
   0x1   :  { %s2542_s17 = smov 0  }
   0x2 LB: > { %s27_s18 = sadd.s32 1, %s2507_s16  ;;  %p1845_p0 = scmp.ge.s32.totalorder %s2511_s17, 1  ;;  %s2511_s17 = sphi %s2542_s17, %s15_s17   ;;  %s2507_s16 = sphi %s2540_s16, %s2839_s16   ;;  %s2503_s15 = sphi %s2538_s15, %s2838_s15  }
   0x3   : > { %p29_p1 = scmp.ge.s32.totalorder %s27_s18, 2  ;;  %p208_p2 = scmp.lt.s32.totalorder %s2511_s17, 3 }
   0x5   : > { %s2841_s18 = smov (%p29_p1, %s27_s18), 0  ;;  %p209_p3 = pnand %p1845_p0, %p208_p2 }
   0x6   : > { %v2361_v0 = vld [vmem:[%s2834_s1 + $0x40] sm:$0xff] (!%p209_p3)   ;;  %v2365_v4 = vld [vmem:[%s2834_s1 + $0x48] sm:$0xff] (!%p209_p3)   ;;  %v2369_v8 = vld [vmem:[%s2834_s1 + $0x50] sm:$0xff] (!%p209_p3)   ;;  %s1846_s29 = sshll.u32 (!%p209_p3), %s2503_s15, 5 }
   0x7   : > { %212 = sbr.rel (%p209_p3) target bundleno = 383 (0x17f), region = 32  ;;  %v2362_v1 = vld [vmem:[%s2834_s1 + $0xc0] sm:$0xff] (!%p209_p3)   ;;  %2113 = vmatprep.subr.bf16.mxu0 (!%p209_p3), %v2361_v0  ;;  %v2366_v5 = vld [vmem:[%s2834_s1 + $0xc8] sm:$0xff] (!%p209_p3)   ;;  %v2370_v9 = vld [vmem:[%s2834_s1 + $0xd0] sm:$0xff] (!%p209_p3)   ;;  %p256_p4 = scmp.lt.s32.totalorder (!%p209_p3), %s1846_s29, 63 }
   0x8   : > { %v2363_v2 = vld [vmem:[%s2834_s1] sm:$0xff] (!%p209_p3)   ;;  %2225 = vmatprep.subr.bf16.mxu1 (!%p209_p3), %v2362_v1  ;;  %v2367_v6 = vld [vmem:[%s2834_s1 + $0x8] sm:$0xff] (!%p209_p3)   ;;  %v2371_v10 = vld [vmem:[%s2834_s1 + $0x10] sm:$0xff] (!%p209_p3)  }
   0x9   : > { %v2364_v3 = vld [vmem:[%s2834_s1 + $0x80] sm:$0xff] (!%p209_p3)   ;;  %2114 = vmatpush3.bf16.msra.mxu0 (!%p209_p3), %v2363_v2  ;;  %v2368_v7 = vld [vmem:[%s2834_s1 + $0x88] sm:$0xff] (!%p209_p3)   ;;  %v2372_v11 = vld [vmem:[%s2834_s1 + $0x90] sm:$0xff] (!%p209_p3)  }
   0xa   : > { %2226 = vmatpush3.bf16.msra.mxu1 (!%p209_p3), %v2364_v3  ;;  %2115 = vmatprep.subr.bf16.mxu0 (!%p209_p3), %v2365_v4  ;;  %v2373_v12 = vld [vmem:[%s2834_s1 + $0x58] sm:$0xff] (!%p209_p3)   ;;  %v2377_v16 = vld [vmem:[%s2834_s1 + $0x60] sm:$0xff] (!%p209_p3)   ;;  %v2381_v20 = vld [vmem:[%s2834_s1 + $0x68] sm:$0xff] (!%p209_p3)  }
   0xb   : > { %2227 = vmatprep.subr.bf16.mxu1 (!%p209_p3), %v2366_v5  ;;  %v2374_v13 = vld [vmem:[%s2834_s1 + $0xd8] sm:$0xff] (!%p209_p3)   ;;  %v2378_v17 = vld [vmem:[%s2834_s1 + $0xe0] sm:$0xff] (!%p209_p3)   ;;  %v2382_v21 = vld [vmem:[%s2834_s1 + $0xe8] sm:$0xff] (!%p209_p3)  }
   0xc   : > { %v2375_v14 = vld [vmem:[%s2834_s1 + $0x18] sm:$0xff] (!%p209_p3)   ;;  %v2379_v18 = vld [vmem:[%s2834_s1 + $0x20] sm:$0xff] (!%p209_p3)   ;;  %v2383_v22 = vld [vmem:[%s2834_s1 + $0x28] sm:$0xff] (!%p209_p3)  }
   0xd   : > { %2116 = vmatpush3.bf16.msra.mxu0 (!%p209_p3), %v2367_v6  ;;  %v2376_v15 = vld [vmem:[%s2834_s1 + $0x98] sm:$0xff] (!%p209_p3)   ;;  %v2380_v19 = vld [vmem:[%s2834_s1 + $0xa0] sm:$0xff] (!%p209_p3)   ;;  %v2384_v23 = vld [vmem:[%s2834_s1 + $0xa8] sm:$0xff] (!%p209_p3)  }
   0xe   : > { %2228 = vmatpush3.bf16.msra.mxu1 %v2368_v7  ;;  %2117 = vmatprep.subr.bf16.mxu0 %v2369_v8  ;;  %s2843_s29 = smov (!%p256_p4, %s1846_s29), 63  ;;  %v2385_v24 = vld [vmem:[%s2834_s1 + $0x70] sm:$0xff]   ;;  %v2389_v28 = vld [vmem:[%s2834_s1 + $0x78] sm:$0xff]  }
   0xf   : > { %2229 = vmatprep.subr.bf16.mxu1 %v2370_v9  ;;  %v2386_v25 = vld [vmem:[%s2834_s1 + $0xf0] sm:$0xff]   ;;  %s1985_s30 = sshll.u32 %s2843_s29, 4  ;;  %v2390_v29 = vld [vmem:[%s2834_s1 + $0xf8] sm:$0xff]   ;;  %s1850_s21 = sshll.u32 %s2843_s29, 3 }
  0x10   : > { %v2387_v26 = vld [vmem:[%s2834_s1 + $0x30] sm:$0xff]   ;;  %s2655_s12 = scalar_lea.vmem %s2833_s0, %s1985_s30  ;;  %v2391_v30 = vld [vmem:[%s2834_s1 + $0x38] sm:$0xff]   ;;  %s2731_s24 = scalar_lea.vmem %s2835_s2, %s1850_s21 }
  0x11   : > { %2118 = vmatpush3.bf16.msra.mxu0 %v2371_v10  ;;  %v2388_v27 = vld [vmem:[%s2834_s1 + $0xb0] sm:$0xff]   ;;  %v2392_v31 = vld [vmem:[%s2834_s1 + $0xb8] sm:$0xff]   ;;  %s1852_s25 = sshll.u32 %s2843_s29, 2  ;;  %s2738_s28 = scalar_lea.vmem %s2837_s4, %s1850_s21 }
  0x12   : > { %2230 = vmatpush3.bf16.msra.mxu1 %v2372_v11  ;;  %2119 = vmatprep.subr.bf16.mxu0 %v2373_v12  ;;  %v2393_v32 = vld [vmem:[%s2655_s12] ss:$16 sps:$4 sm:$0xff]   ;;  %v2395_v33 = vld [vmem:[%s2655_s12 + $0x4] ss:$16 sps:$4 sm:$0xff]   ;;  %v2396_v34 = vld [vmem:[%s2655_s12 + $0x8] ss:$16 sps:$4 sm:$0xff]   ;;  %s2744_s6 = scalar_lea.vmem %s2836_s3, %s1852_s25 }
  0x13   : > { %2231 = vmatprep.subr.bf16.mxu1 %v2374_v13  ;;  %v2398_v35 = vld [vmem:[%s2655_s12 + $0xc] ss:$16 sps:$4 sm:$0xff]   ;;  %1031 = vmatprep.mubr.bf16.mxu0 %v2395_v33  ;;  %v2399_v36 = vld [vmem:[%s2655_s12 + $0x24] ss:$16 sps:$4 sm:$0xff]   ;;  %v2403_v38 = vld [vmem:[%s2655_s12 + $0x20] ss:$16 sps:$4 sm:$0xff]  }
  0x14   : > { %1192 = vmatprep.mubr.bf16.mxu1 %v2398_v35  ;;  %v2401_v37 = vld [vmem:[%s2655_s12 + $0x2c] ss:$16 sps:$4 sm:$0xff]   ;;  %v2404_v39 = vld [vmem:[%s2655_s12 + $0x28] ss:$16 sps:$4 sm:$0xff]   ;;  %v2405_v40 = vld [vmem:[%s2655_s12 + $0x44] ss:$16 sps:$4 sm:$0xff]  }
  0x15   : > { %2120 = vmatpush3.bf16.msra.mxu0 %v2375_v14  ;;  %v2407_v41 = vld [vmem:[%s2655_s12 + $0x4c] ss:$16 sps:$4 sm:$0xff]   ;;  %v2409_v42 = vld [vmem:[%s2655_s12 + $0x40] ss:$16 sps:$4 sm:$0xff]   ;;  %v2410_v43 = vld [vmem:[%s2655_s12 + $0x48] ss:$16 sps:$4 sm:$0xff]  }
  0x16   : > { %2232 = vmatpush3.bf16.msra.mxu1 %v2376_v15  ;;  %2121 = vmatprep.subr.bf16.mxu0 %v2377_v16  ;;  %v2411_v44 = vld [vmem:[%s2655_s12 + $0x64] ss:$16 sps:$4 sm:$0xff]   ;;  %v2413_v45 = vld [vmem:[%s2655_s12 + $0x6c] ss:$16 sps:$4 sm:$0xff]   ;;  %v2415_v46 = vld [vmem:[%s2655_s12 + $0x60] ss:$16 sps:$4 sm:$0xff]  }
  0x17   : > { %2233 = vmatprep.subr.bf16.mxu1 %v2378_v17  ;;  %v2416_v47 = vld [vmem:[%s2655_s12 + $0x68] ss:$16 sps:$4 sm:$0xff]   ;;  %v2417_v48 = vld [vmem:[%s2655_s12 + $0x84] ss:$16 sps:$4 sm:$0xff]   ;;  %v2419_v49 = vld [vmem:[%s2655_s12 + $0x8c] ss:$16 sps:$4 sm:$0xff]  }
  0x18   : > { %v2421_v50 = vld [vmem:[%s2655_s12 + $0x80] ss:$16 sps:$4 sm:$0xff]   ;;  %v2422_v51 = vld [vmem:[%s2655_s12 + $0x88] ss:$16 sps:$4 sm:$0xff]   ;;  %v2423_v52 = vld [vmem:[%s2655_s12 + $0xa4] ss:$16 sps:$4 sm:$0xff]  }
  0x19   : > { %2122 = vmatpush3.bf16.msra.mxu0 %v2379_v18  ;;  %v2425_v53 = vld [vmem:[%s2655_s12 + $0xac] ss:$16 sps:$4 sm:$0xff]   ;;  %v2427_v54 = vld [vmem:[%s2655_s12 + $0xa0] ss:$16 sps:$4 sm:$0xff]   ;;  %v2428_v55 = vld [vmem:[%s2655_s12 + $0xa8] ss:$16 sps:$4 sm:$0xff]  }
  0x1a   : > { %2234 = vmatpush3.bf16.msra.mxu1 %v2380_v19  ;;  %2123 = vmatprep.subr.bf16.mxu0 %v2381_v20  ;;  %v2429_v56 = vld [vmem:[%s2655_s12 + $0xc4] ss:$16 sps:$4 sm:$0xff]   ;;  %v2431_v57 = vld [vmem:[%s2655_s12 + $0xcc] ss:$16 sps:$4 sm:$0xff]   ;;  %v2433_v58 = vld [vmem:[%s2655_s12 + $0xc0] ss:$16 sps:$4 sm:$0xff]  }
  0x1b   : > { %2235 = vmatprep.subr.bf16.mxu1 %v2382_v21  ;;  %v2434_v59 = vld [vmem:[%s2655_s12 + $0xc8] ss:$16 sps:$4 sm:$0xff]   ;;  %v2435_v60 = vld [vmem:[%s2655_s12 + $0xe4] ss:$16 sps:$4 sm:$0xff]   ;;  %v2437_v61 = vld [vmem:[%s2655_s12 + $0xec] ss:$16 sps:$4 sm:$0xff]  }
  0x1c   : > { %v2439_v62 = vld [vmem:[%s2655_s12 + $0xe0] ss:$16 sps:$4 sm:$0xff]   ;;  %v2440_v63 = vld [vmem:[%s2655_s12 + $0xe8] ss:$16 sps:$4 sm:$0xff]   ;;  %v2441_v0 = vld [vmem:[%s2655_s12 + $0x104] ss:$16 sps:$4 sm:$0xff]  }
  0x1d   : > { %2124 = vmatpush3.bf16.msra.mxu0 %v2383_v22  ;;  %v2443_v1 = vld [vmem:[%s2655_s12 + $0x10c] ss:$16 sps:$4 sm:$0xff]   ;;  %v2445_v2 = vld [vmem:[%s2655_s12 + $0x100] ss:$16 sps:$4 sm:$0xff]   ;;  %v2446_v3 = vld [vmem:[%s2655_s12 + $0x108] ss:$16 sps:$4 sm:$0xff]  }
  0x1e   : > { %2236 = vmatpush3.bf16.msra.mxu1 %v2384_v23  ;;  %2125 = vmatprep.subr.bf16.mxu0 %v2385_v24  ;;  %v2447_v4 = vld [vmem:[%s2655_s12 + $0x124] ss:$16 sps:$4 sm:$0xff]   ;;  %v2449_v5 = vld [vmem:[%s2655_s12 + $0x12c] ss:$16 sps:$4 sm:$0xff]   ;;  %v2451_v6 = vld [vmem:[%s2655_s12 + $0x120] ss:$16 sps:$4 sm:$0xff]  }
  0x1f   : > { %2237 = vmatprep.subr.bf16.mxu1 %v2386_v25  ;;  %v2452_v7 = vld [vmem:[%s2655_s12 + $0x128] ss:$16 sps:$4 sm:$0xff]   ;;  %v2453_v8 = vld [vmem:[%s2655_s12 + $0x144] ss:$16 sps:$4 sm:$0xff]   ;;  %v2455_v9 = vld [vmem:[%s2655_s12 + $0x14c] ss:$16 sps:$4 sm:$0xff]  }
  0x20   : > { %v2457_v10 = vld [vmem:[%s2655_s12 + $0x140] ss:$16 sps:$4 sm:$0xff]   ;;  %v2458_v11 = vld [vmem:[%s2655_s12 + $0x148] ss:$16 sps:$4 sm:$0xff]   ;;  %v2459_v12 = vld [vmem:[%s2655_s12 + $0x164] ss:$16 sps:$4 sm:$0xff]  }
  0x21   : > { %2126 = vmatpush3.bf16.msra.mxu0 %v2387_v26  ;;  %v2461_v13 = vld [vmem:[%s2655_s12 + $0x16c] ss:$16 sps:$4 sm:$0xff]   ;;  %v2463_v14 = vld [vmem:[%s2655_s12 + $0x160] ss:$16 sps:$4 sm:$0xff]   ;;  %v2464_v15 = vld [vmem:[%s2655_s12 + $0x168] ss:$16 sps:$4 sm:$0xff]  }
  0x22   : > { %2238 = vmatpush3.bf16.msra.mxu1 %v2388_v27  ;;  %2127 = vmatprep.subr.bf16.mxu0 %v2389_v28  ;;  %v2465_v16 = vld [vmem:[%s2655_s12 + $0x184] ss:$16 sps:$4 sm:$0xff]   ;;  %v2467_v17 = vld [vmem:[%s2655_s12 + $0x18c] ss:$16 sps:$4 sm:$0xff]   ;;  %v2469_v18 = vld [vmem:[%s2655_s12 + $0x180] ss:$16 sps:$4 sm:$0xff]  }
  0x23   : > { %2239 = vmatprep.subr.bf16.mxu1 %v2390_v29  ;;  %v2470_v19 = vld [vmem:[%s2655_s12 + $0x188] ss:$16 sps:$4 sm:$0xff]   ;;  %v2471_v20 = vld [vmem:[%s2655_s12 + $0x1a4] ss:$16 sps:$4 sm:$0xff]   ;;  %v2473_v21 = vld [vmem:[%s2655_s12 + $0x1ac] ss:$16 sps:$4 sm:$0xff]  }
  0x24   : > { %v2475_v22 = vld [vmem:[%s2655_s12 + $0x1a0] ss:$16 sps:$4 sm:$0xff]   ;;  %v2476_v23 = vld [vmem:[%s2655_s12 + $0x1a8] ss:$16 sps:$4 sm:$0xff]   ;;  %v2477_v24 = vld [vmem:[%s2655_s12 + $0x1c4] ss:$16 sps:$4 sm:$0xff]  }
  0x25   : > { %2128 = vmatpush3.bf16.msra.mxu0 %v2391_v30  ;;  %v2479_v25 = vld [vmem:[%s2655_s12 + $0x1cc] ss:$16 sps:$4 sm:$0xff]   ;;  %v2481_v26 = vld [vmem:[%s2655_s12 + $0x1c0] ss:$16 sps:$4 sm:$0xff]   ;;  %v2482_v27 = vld [vmem:[%s2655_s12 + $0x1c8] ss:$16 sps:$4 sm:$0xff]  }
  0x26   : > { %2240 = vmatpush3.bf16.msra.mxu1 %v2392_v31  ;;  %v2483_v28 = vld [vmem:[%s2655_s12 + $0x1e4] ss:$16 sps:$4 sm:$0xff]   ;;  %v2485_v29 = vld [vmem:[%s2655_s12 + $0x1ec] ss:$16 sps:$4 sm:$0xff]   ;;  %v2487_v30 = vld [vmem:[%s2655_s12 + $0x1e0] ss:$16 sps:$4 sm:$0xff]  }
  0x27   : > { %v2488_v31 = vld [vmem:[%s2655_s12 + $0x1e8] ss:$16 sps:$4 sm:$0xff]  }
  0x28   : > { %1032 = vmatmul.mubr.bf16.vlgmr.msra.gmra.mrb[0].mxu0 %v2393_v32 }
  0x29   : > { %1193 = vmatmul.mubr.bf16.vlgmr.msra.gmra.mrb[0].mxu1 %v2396_v34  ;;  %1039 = vmatprep.mubr.bf16.mxu0 %v2399_v36 }
  0x2a   : > { %1200 = vmatprep.mubr.bf16.mxu1 %v2401_v37 }
  0x30   : > { %1040 = vmatmul.mubr.bf16.gmra.mrb[4].mxu0 %v2403_v38 }
  0x31   : > { %1201 = vmatmul.mubr.bf16.gmra.mrb[4].mxu1 %v2404_v39  ;;  %1047 = vmatprep.mubr.bf16.mxu0 %v2405_v40 }
  0x32   : > { %1208 = vmatprep.mubr.bf16.mxu1 %v2407_v41  ;;  %v1580_v41 = vld [vmem:[%s2731_s24] sm:$0xff] }
  0x38   : > { %1048 = vmatmul.mubr.bf16.gmra.mrb[8].mxu0 %v2409_v42 }
  0x39   : > { %1209 = vmatmul.mubr.bf16.gmra.mrb[8].mxu1 %v2410_v43  ;;  %1055 = vmatprep.mubr.bf16.mxu0 %v2411_v44 }
  0x3a   : > { %1216 = vmatprep.mubr.bf16.mxu1 %v2413_v45 }
  0x40   : > { %1056 = vmatmul.mubr.bf16.gmra.mrb[12].mxu0 %v2415_v46  ;;  %v1581_v46 = vld [vmem:[%s2731_s24 + $0x8] sm:$0xff] }
  0x41   : > { %1217 = vmatmul.mubr.bf16.gmra.mrb[12].mxu1 %v2416_v47  ;;  %1063 = vmatprep.mubr.bf16.mxu0 %v2417_v48 }
  0x42   : > { %1224 = vmatprep.mubr.bf16.mxu1 %v2419_v49 }
  0x48   : > { %1064 = vmatmul.mubr.bf16.gmra.mrb[16].mxu0 %v2421_v50 }
  0x49   : > { %1225 = vmatmul.mubr.bf16.gmra.mrb[16].mxu1 %v2422_v51  ;;  %1071 = vmatprep.mubr.bf16.mxu0 %v2423_v52 }
  0x4a   : > { %1232 = vmatprep.mubr.bf16.mxu1 %v2425_v53 }
  0x50   : > { %1072 = vmatmul.mubr.bf16.gmra.mrb[20].mxu0 %v2427_v54 }
  0x51   : > { %1233 = vmatmul.mubr.bf16.gmra.mrb[20].mxu1 %v2428_v55  ;;  %1079 = vmatprep.mubr.bf16.mxu0 %v2429_v56 }
  0x52   : > { %1240 = vmatprep.mubr.bf16.mxu1 %v2431_v57 }
  0x58   : > { %1080 = vmatmul.mubr.bf16.gmra.mrb[24].mxu0 %v2433_v58 }
  0x59   : > { %1241 = vmatmul.mubr.bf16.gmra.mrb[24].mxu1 %v2434_v59  ;;  %1087 = vmatprep.mubr.bf16.mxu0 %v2435_v60  ;;  %v1582_v60 = vld [vmem:[%s2731_s24 + $0x10] sm:$0xff] }
  0x5a   : > { %1248 = vmatprep.mubr.bf16.mxu1 %v2437_v61 }
  0x60   : > { %1088 = vmatmul.mubr.bf16.gmra.mrb[28].mxu0 %v2439_v62 }
  0x61   : > { %1249 = vmatmul.mubr.bf16.gmra.mrb[28].mxu1 %v2440_v63  ;;  %1095 = vmatprep.mubr.bf16.mxu0 %v2441_v0 }
  0x62   : > { %1256 = vmatprep.mubr.bf16.mxu1 %v2443_v1  ;;  %v1583_v1 = vld [vmem:[%s2731_s24 + $0x18] sm:$0xff] }
  0x68   : > { %1096 = vmatmul.mubr.bf16.gmra.mrb[32].mxu0 %v2445_v2 }
  0x69   : > { %1257 = vmatmul.mubr.bf16.gmra.mrb[32].mxu1 %v2446_v3  ;;  %1103 = vmatprep.mubr.bf16.mxu0 %v2447_v4 }
  0x6a   : > { %1264 = vmatprep.mubr.bf16.mxu1 %v2449_v5 }
  0x70   : > { %1104 = vmatmul.mubr.bf16.gmra.mrb[36].mxu0 %v2451_v6 }
  0x71   : > { %1265 = vmatmul.mubr.bf16.gmra.mrb[36].mxu1 %v2452_v7  ;;  %1111 = vmatprep.mubr.bf16.mxu0 %v2453_v8 }
  0x72   : > { %1272 = vmatprep.mubr.bf16.mxu1 %v2455_v9 }
  0x78   : > { %1112 = vmatmul.mubr.bf16.gmra.mrb[40].mxu0 %v2457_v10 }
  0x79   : > { %1273 = vmatmul.mubr.bf16.gmra.mrb[40].mxu1 %v2458_v11  ;;  %1119 = vmatprep.mubr.bf16.mxu0 %v2459_v12 }
  0x7a   : > { %1280 = vmatprep.mubr.bf16.mxu1 %v2461_v13 }
  0x80   : > { %1120 = vmatmul.mubr.bf16.gmra.mrb[44].mxu0 %v2463_v14 }
  0x81   : > { %1281 = vmatmul.mubr.bf16.gmra.mrb[44].mxu1 %v2464_v15  ;;  %1127 = vmatprep.mubr.bf16.mxu0 %v2465_v16  ;;  %v1584_v15 = vld [vmem:[%s2731_s24 + $0x20] sm:$0xff] }
  0x82   : > { %1288 = vmatprep.mubr.bf16.mxu1 %v2467_v17 }
  0x88   : > { %1128 = vmatmul.mubr.bf16.gmra.mrb[48].mxu0 %v2469_v18 }
  0x89   : > { %1289 = vmatmul.mubr.bf16.gmra.mrb[48].mxu1 %v2470_v19  ;;  %1135 = vmatprep.mubr.bf16.mxu0 %v2471_v20  ;;  %v1585_v20 = vld [vmem:[%s2731_s24 + $0x28] sm:$0xff] }
  0x8a   : > { %1296 = vmatprep.mubr.bf16.mxu1 %v2473_v21 }
  0x90   : > { %1136 = vmatmul.mubr.bf16.gmra.mrb[52].mxu0 %v2475_v22 }
  0x91   : > { %1297 = vmatmul.mubr.bf16.gmra.mrb[52].mxu1 %v2476_v23  ;;  %1143 = vmatprep.mubr.bf16.mxu0 %v2477_v24 }
  0x92   : > { %1304 = vmatprep.mubr.bf16.mxu1 %v2479_v25 }
  0x98   : > { %1144 = vmatmul.mubr.bf16.gmra.mrb[56].mxu0 %v2481_v26 }
  0x99   : > { %1305 = vmatmul.mubr.bf16.gmra.mrb[56].mxu1 %v2482_v27  ;;  %1151 = vmatprep.mubr.bf16.mxu0 %v2483_v28 }
  0x9a   : > { %1312 = vmatprep.mubr.bf16.mxu1 %v2485_v29 }
  0xa0   : > { %1152 = vmatmul.mubr.bf16.gmra.mrb[60].mxu0 %v2487_v30 }
  0xa1   : > { %1313 = vmatmul.mubr.bf16.gmra.mrb[60].mxu1 %v2488_v31 }
  0xfb   : > { %v2129_v32 = vpop.f32.mrb[0].mxu0 }
  0xfc   : > { %v2241_v33 = vpop.f32.mrb[0].mxu1  ;;  %v2130_v34 = vpop.f32.mrb[1].mxu0 }
  0xfd   : > { %v2131_v35 = vadd.f32 %v2130_v34, %v2129_v32  ;;  %v2242_v36 = vpop.f32.mrb[1].mxu1  ;;  %v2132_v37 = vpop.f32.mrb[2].mxu0  ;;  %v1586_v34 = vld [vmem:[%s2731_s24 + $0x30] sm:$0xff] }
  0xfe   : > { %v2243_v38 = vadd.f32 %v2242_v36, %v2241_v33  ;;  %v2244_v39 = vpop.f32.mrb[2].mxu1  ;;  %v2133_v40 = vpop.f32.mrb[3].mxu0 }
  0xff   : > { %v2134_v42 = vadd.f32 %v2133_v40, %v2132_v37  ;;  %v2245_v43 = vpop.f32.mrb[3].mxu1 }
 0x100   : > { %v1195_v44 = vadd.f32 %v2243_v38, %v2131_v35  ;;  %v2246_v45 = vadd.f32 %v2245_v43, %v2244_v39  ;;  %v1587_v39 = vld [vmem:[%s2731_s24 + $0x38] sm:$0xff] }
 0x102   : > { %v1644_v47 = vadd.f32 %v1580_v41, %v1195_v44  ;;  %v1198_v48 = vadd.f32 %v2246_v45, %v2134_v42 }
 0x103   : > { %v2135_v49 = vpop.f32.mrb[4].mxu0 }
 0x104   : > { %1676 = vst [vmem:[%s2738_s28] sm:$0xff] %v1644_v47  ;;  %v2021_v50 = vpack.c.bf16 %v1198_v48, %v1195_v44  ;;  %v1645_v51 = vadd.f32 %v1581_v46, %v1198_v48  ;;  %v2247_v52 = vpop.f32.mrb[4].mxu1  ;;  %v2136_v53 = vpop.f32.mrb[5].mxu0 }
 0x105   : > { %v2137_v54 = vadd.f32 %v2136_v53, %v2135_v49  ;;  %v2248_v55 = vpop.f32.mrb[5].mxu1  ;;  %v2138_v56 = vpop.f32.mrb[6].mxu0  ;;  %v1588_v53 = vld [vmem:[%s2731_s24 + $0x40] sm:$0xff] }
 0x106   : > { %2022 = vst [vmem:[%s2744_s6] sm:$0xff] %v2021_v50   ;;  %1677 = vst [vmem:[%s2738_s28 + $0x8] sm:$0xff] %v1645_v51  ;;  %v2249_v57 = vadd.f32 %v2248_v55, %v2247_v52  ;;  %v2250_v58 = vpop.f32.mrb[6].mxu1  ;;  %v2139_v59 = vpop.f32.mrb[7].mxu0 }
 0x107   : > { %v2140_v61 = vadd.f32 %v2139_v59, %v2138_v56  ;;  %v2251_v62 = vpop.f32.mrb[7].mxu1 }
 0x108   : > { %v1203_v63 = vadd.f32 %v2249_v57, %v2137_v54  ;;  %v2252_v0 = vadd.f32 %v2251_v62, %v2250_v58  ;;  %v1589_v58 = vld [vmem:[%s2731_s24 + $0x48] sm:$0xff] }
 0x10a   : > { %v1646_v2 = vadd.f32 %v1582_v60, %v1203_v63  ;;  %v1206_v3 = vadd.f32 %v2252_v0, %v2140_v61 }
 0x10b   : > { %v2141_v4 = vpop.f32.mrb[8].mxu0 }
 0x10c   : > { %1678 = vst [vmem:[%s2738_s28 + $0x10] sm:$0xff] %v1646_v2  ;;  %v2026_v5 = vpack.c.bf16 %v1206_v3, %v1203_v63  ;;  %v1647_v6 = vadd.f32 %v1583_v1, %v1206_v3  ;;  %v2253_v7 = vpop.f32.mrb[8].mxu1  ;;  %v2142_v8 = vpop.f32.mrb[9].mxu0 }
 0x10d   : > { %v2143_v9 = vadd.f32 %v2142_v8, %v2141_v4  ;;  %v2254_v10 = vpop.f32.mrb[9].mxu1  ;;  %v2144_v11 = vpop.f32.mrb[10].mxu0  ;;  %v1590_v8 = vld [vmem:[%s2731_s24 + $0x50] sm:$0xff] }
 0x10e   : > { %2098 = vst [vmem:[%s2744_s6 + $0x8] sm:$0xff] %v2026_v5   ;;  %1679 = vst [vmem:[%s2738_s28 + $0x18] sm:$0xff] %v1647_v6  ;;  %v2255_v12 = vadd.f32 %v2254_v10, %v2253_v7  ;;  %v2256_v13 = vpop.f32.mrb[10].mxu1  ;;  %v2145_v14 = vpop.f32.mrb[11].mxu0 }
 0x10f   : > { %v2146_v16 = vadd.f32 %v2145_v14, %v2144_v11  ;;  %v2257_v17 = vpop.f32.mrb[11].mxu1 }
 0x110   : > { %v1211_v18 = vadd.f32 %v2255_v12, %v2143_v9  ;;  %v2258_v19 = vadd.f32 %v2257_v17, %v2256_v13  ;;  %v1591_v13 = vld [vmem:[%s2731_s24 + $0x58] sm:$0xff] }
 0x112   : > { %v1648_v21 = vadd.f32 %v1584_v15, %v1211_v18  ;;  %v1214_v22 = vadd.f32 %v2258_v19, %v2146_v16 }
 0x113   : > { %v2147_v23 = vpop.f32.mrb[12].mxu0 }
 0x114   : > { %1680 = vst [vmem:[%s2738_s28 + $0x20] sm:$0xff] %v1648_v21  ;;  %v2031_v24 = vpack.c.bf16 %v1214_v22, %v1211_v18  ;;  %v1649_v25 = vadd.f32 %v1585_v20, %v1214_v22  ;;  %v2259_v26 = vpop.f32.mrb[12].mxu1  ;;  %v2148_v27 = vpop.f32.mrb[13].mxu0 }
 0x115   : > { %v2149_v28 = vadd.f32 %v2148_v27, %v2147_v23  ;;  %v2260_v29 = vpop.f32.mrb[13].mxu1  ;;  %v2150_v30 = vpop.f32.mrb[14].mxu0  ;;  %v1592_v27 = vld [vmem:[%s2731_s24 + $0x60] sm:$0xff] }
 0x116   : > { %2099 = vst [vmem:[%s2744_s6 + $0x10] sm:$0xff] %v2031_v24   ;;  %1681 = vst [vmem:[%s2738_s28 + $0x28] sm:$0xff] %v1649_v25  ;;  %v2261_v31 = vadd.f32 %v2260_v29, %v2259_v26  ;;  %v2262_v32 = vpop.f32.mrb[14].mxu1  ;;  %v2151_v33 = vpop.f32.mrb[15].mxu0 }
 0x117   : > { %v2152_v35 = vadd.f32 %v2151_v33, %v2150_v30  ;;  %v2263_v36 = vpop.f32.mrb[15].mxu1 }
 0x118   : > { %v1219_v37 = vadd.f32 %v2261_v31, %v2149_v28  ;;  %v2264_v38 = vadd.f32 %v2263_v36, %v2262_v32  ;;  %v1593_v32 = vld [vmem:[%s2731_s24 + $0x68] sm:$0xff] }
 0x11a   : > { %v1650_v40 = vadd.f32 %v1586_v34, %v1219_v37  ;;  %v1222_v41 = vadd.f32 %v2264_v38, %v2152_v35 }
 0x11b   : > { %v2153_v42 = vpop.f32.mrb[16].mxu0 }
 0x11c   : > { %1682 = vst [vmem:[%s2738_s28 + $0x30] sm:$0xff] %v1650_v40  ;;  %v2036_v43 = vpack.c.bf16 %v1222_v41, %v1219_v37  ;;  %v1651_v44 = vadd.f32 %v1587_v39, %v1222_v41  ;;  %v2265_v45 = vpop.f32.mrb[16].mxu1  ;;  %v2154_v46 = vpop.f32.mrb[17].mxu0 }
 0x11d   : > { %v2155_v47 = vadd.f32 %v2154_v46, %v2153_v42  ;;  %v2266_v48 = vpop.f32.mrb[17].mxu1  ;;  %v2156_v49 = vpop.f32.mrb[18].mxu0  ;;  %v1594_v46 = vld [vmem:[%s2731_s24 + $0x70] sm:$0xff] }
 0x11e   : > { %2100 = vst [vmem:[%s2744_s6 + $0x18] sm:$0xff] %v2036_v43   ;;  %1683 = vst [vmem:[%s2738_s28 + $0x38] sm:$0xff] %v1651_v44  ;;  %v2267_v50 = vadd.f32 %v2266_v48, %v2265_v45  ;;  %v2268_v51 = vpop.f32.mrb[18].mxu1  ;;  %v2157_v52 = vpop.f32.mrb[19].mxu0 }
 0x11f   : > { %v2158_v54 = vadd.f32 %v2157_v52, %v2156_v49  ;;  %v2269_v55 = vpop.f32.mrb[19].mxu1 }
 0x120   : > { %v1227_v56 = vadd.f32 %v2267_v50, %v2155_v47  ;;  %v2270_v57 = vadd.f32 %v2269_v55, %v2268_v51  ;;  %v1595_v51 = vld [vmem:[%s2731_s24 + $0x78] sm:$0xff] }
 0x122   : > { %v1652_v59 = vadd.f32 %v1588_v53, %v1227_v56  ;;  %v1230_v60 = vadd.f32 %v2270_v57, %v2158_v54 }
 0x123   : > { %v2159_v61 = vpop.f32.mrb[20].mxu0 }
 0x124   : > { %1684 = vst [vmem:[%s2738_s28 + $0x40] sm:$0xff] %v1652_v59  ;;  %v2041_v62 = vpack.c.bf16 %v1230_v60, %v1227_v56  ;;  %v1653_v63 = vadd.f32 %v1589_v58, %v1230_v60  ;;  %v2271_v0 = vpop.f32.mrb[20].mxu1  ;;  %v2160_v1 = vpop.f32.mrb[21].mxu0 }
 0x125   : > { %v2161_v2 = vadd.f32 %v2160_v1, %v2159_v61  ;;  %v2272_v3 = vpop.f32.mrb[21].mxu1  ;;  %v2162_v4 = vpop.f32.mrb[22].mxu0  ;;  %v1596_v1 = vld [vmem:[%s2731_s24 + $0x80] sm:$0xff] }
 0x126   : > { %2101 = vst [vmem:[%s2744_s6 + $0x20] sm:$0xff] %v2041_v62   ;;  %1685 = vst [vmem:[%s2738_s28 + $0x48] sm:$0xff] %v1653_v63  ;;  %v2273_v5 = vadd.f32 %v2272_v3, %v2271_v0  ;;  %v2274_v6 = vpop.f32.mrb[22].mxu1  ;;  %v2163_v7 = vpop.f32.mrb[23].mxu0 }
 0x127   : > { %v2164_v9 = vadd.f32 %v2163_v7, %v2162_v4  ;;  %v2275_v10 = vpop.f32.mrb[23].mxu1 }
 0x128   : > { %v1235_v11 = vadd.f32 %v2273_v5, %v2161_v2  ;;  %v2276_v12 = vadd.f32 %v2275_v10, %v2274_v6  ;;  %v1597_v6 = vld [vmem:[%s2731_s24 + $0x88] sm:$0xff] }
 0x12a   : > { %v1654_v14 = vadd.f32 %v1590_v8, %v1235_v11  ;;  %v1238_v15 = vadd.f32 %v2276_v12, %v2164_v9 }
 0x12b   : > { %v2165_v16 = vpop.f32.mrb[24].mxu0 }
 0x12c   : > { %1686 = vst [vmem:[%s2738_s28 + $0x50] sm:$0xff] %v1654_v14  ;;  %v2046_v17 = vpack.c.bf16 %v1238_v15, %v1235_v11  ;;  %v1655_v18 = vadd.f32 %v1591_v13, %v1238_v15  ;;  %v2277_v19 = vpop.f32.mrb[24].mxu1  ;;  %v2166_v20 = vpop.f32.mrb[25].mxu0 }
 0x12d   : > { %v2167_v21 = vadd.f32 %v2166_v20, %v2165_v16  ;;  %v2278_v22 = vpop.f32.mrb[25].mxu1  ;;  %v2168_v23 = vpop.f32.mrb[26].mxu0  ;;  %v1598_v20 = vld [vmem:[%s2731_s24 + $0x90] sm:$0xff] }
 0x12e   : > { %2102 = vst [vmem:[%s2744_s6 + $0x28] sm:$0xff] %v2046_v17   ;;  %1687 = vst [vmem:[%s2738_s28 + $0x58] sm:$0xff] %v1655_v18  ;;  %v2279_v24 = vadd.f32 %v2278_v22, %v2277_v19  ;;  %v2280_v25 = vpop.f32.mrb[26].mxu1  ;;  %v2169_v26 = vpop.f32.mrb[27].mxu0 }
 0x12f   : > { %v2170_v28 = vadd.f32 %v2169_v26, %v2168_v23  ;;  %v2281_v29 = vpop.f32.mrb[27].mxu1 }
 0x130   : > { %v1243_v30 = vadd.f32 %v2279_v24, %v2167_v21  ;;  %v2282_v31 = vadd.f32 %v2281_v29, %v2280_v25  ;;  %v1599_v25 = vld [vmem:[%s2731_s24 + $0x98] sm:$0xff] }
 0x132   : > { %v1656_v33 = vadd.f32 %v1592_v27, %v1243_v30  ;;  %v1246_v34 = vadd.f32 %v2282_v31, %v2170_v28 }
 0x133   : > { %v2171_v35 = vpop.f32.mrb[28].mxu0 }
 0x134   : > { %1688 = vst [vmem:[%s2738_s28 + $0x60] sm:$0xff] %v1656_v33  ;;  %v2051_v36 = vpack.c.bf16 %v1246_v34, %v1243_v30  ;;  %v1657_v37 = vadd.f32 %v1593_v32, %v1246_v34  ;;  %v2283_v38 = vpop.f32.mrb[28].mxu1  ;;  %v2172_v39 = vpop.f32.mrb[29].mxu0 }
 0x135   : > { %v2173_v40 = vadd.f32 %v2172_v39, %v2171_v35  ;;  %v2284_v41 = vpop.f32.mrb[29].mxu1  ;;  %v2174_v42 = vpop.f32.mrb[30].mxu0  ;;  %v1600_v39 = vld [vmem:[%s2731_s24 + $0xa0] sm:$0xff] }
 0x136   : > { %2103 = vst [vmem:[%s2744_s6 + $0x30] sm:$0xff] %v2051_v36   ;;  %1689 = vst [vmem:[%s2738_s28 + $0x68] sm:$0xff] %v1657_v37  ;;  %v2285_v43 = vadd.f32 %v2284_v41, %v2283_v38  ;;  %v2286_v44 = vpop.f32.mrb[30].mxu1  ;;  %v2175_v45 = vpop.f32.mrb[31].mxu0 }
 0x137   : > { %v2176_v47 = vadd.f32 %v2175_v45, %v2174_v42  ;;  %v2287_v48 = vpop.f32.mrb[31].mxu1 }
 0x138   : > { %v1251_v49 = vadd.f32 %v2285_v43, %v2173_v40  ;;  %v2288_v50 = vadd.f32 %v2287_v48, %v2286_v44  ;;  %v1601_v44 = vld [vmem:[%s2731_s24 + $0xa8] sm:$0xff] }
 0x13a   : > { %v1658_v52 = vadd.f32 %v1594_v46, %v1251_v49  ;;  %v1254_v53 = vadd.f32 %v2288_v50, %v2176_v47 }
 0x13b   : > { %v2177_v54 = vpop.f32.mrb[32].mxu0 }
 0x13c   : > { %1690 = vst [vmem:[%s2738_s28 + $0x70] sm:$0xff] %v1658_v52  ;;  %v2056_v55 = vpack.c.bf16 %v1254_v53, %v1251_v49  ;;  %v1659_v56 = vadd.f32 %v1595_v51, %v1254_v53  ;;  %v2289_v57 = vpop.f32.mrb[32].mxu1  ;;  %v2178_v58 = vpop.f32.mrb[33].mxu0 }
 0x13d   : > { %v2179_v59 = vadd.f32 %v2178_v58, %v2177_v54  ;;  %v2290_v60 = vpop.f32.mrb[33].mxu1  ;;  %v2180_v61 = vpop.f32.mrb[34].mxu0  ;;  %v1602_v58 = vld [vmem:[%s2731_s24 + $0xb0] sm:$0xff] }
 0x13e   : > { %2104 = vst [vmem:[%s2744_s6 + $0x38] sm:$0xff] %v2056_v55   ;;  %1691 = vst [vmem:[%s2738_s28 + $0x78] sm:$0xff] %v1659_v56  ;;  %v2291_v62 = vadd.f32 %v2290_v60, %v2289_v57  ;;  %v2292_v63 = vpop.f32.mrb[34].mxu1  ;;  %v2181_v0 = vpop.f32.mrb[35].mxu0 }
 0x13f   : > { %v2182_v2 = vadd.f32 %v2181_v0, %v2180_v61  ;;  %v2293_v3 = vpop.f32.mrb[35].mxu1 }
 0x140   : > { %v1259_v4 = vadd.f32 %v2291_v62, %v2179_v59  ;;  %v2294_v5 = vadd.f32 %v2293_v3, %v2292_v63  ;;  %v1603_v63 = vld [vmem:[%s2731_s24 + $0xb8] sm:$0xff] }
 0x142   : > { %v1660_v7 = vadd.f32 %v1596_v1, %v1259_v4  ;;  %v1262_v8 = vadd.f32 %v2294_v5, %v2182_v2 }
 0x143   : > { %v2183_v9 = vpop.f32.mrb[36].mxu0 }
 0x144   : > { %1692 = vst [vmem:[%s2738_s28 + $0x80] sm:$0xff] %v1660_v7  ;;  %v2061_v10 = vpack.c.bf16 %v1262_v8, %v1259_v4  ;;  %v1661_v11 = vadd.f32 %v1597_v6, %v1262_v8  ;;  %v2295_v12 = vpop.f32.mrb[36].mxu1  ;;  %v2184_v13 = vpop.f32.mrb[37].mxu0 }
 0x145   : > { %v2185_v14 = vadd.f32 %v2184_v13, %v2183_v9  ;;  %v2296_v15 = vpop.f32.mrb[37].mxu1  ;;  %v2186_v16 = vpop.f32.mrb[38].mxu0  ;;  %v1604_v13 = vld [vmem:[%s2731_s24 + $0xc0] sm:$0xff] }
 0x146   : > { %2105 = vst [vmem:[%s2744_s6 + $0x40] sm:$0xff] %v2061_v10   ;;  %1693 = vst [vmem:[%s2738_s28 + $0x88] sm:$0xff] %v1661_v11  ;;  %v2297_v17 = vadd.f32 %v2296_v15, %v2295_v12  ;;  %v2298_v18 = vpop.f32.mrb[38].mxu1  ;;  %v2187_v19 = vpop.f32.mrb[39].mxu0 }
 0x147   : > { %v2188_v21 = vadd.f32 %v2187_v19, %v2186_v16  ;;  %v2299_v22 = vpop.f32.mrb[39].mxu1 }
 0x148   : > { %v1267_v23 = vadd.f32 %v2297_v17, %v2185_v14  ;;  %v2300_v24 = vadd.f32 %v2299_v22, %v2298_v18  ;;  %v1605_v18 = vld [vmem:[%s2731_s24 + $0xc8] sm:$0xff] }
 0x14a   : > { %v1662_v26 = vadd.f32 %v1598_v20, %v1267_v23  ;;  %v1270_v27 = vadd.f32 %v2300_v24, %v2188_v21 }
 0x14b   : > { %v2189_v28 = vpop.f32.mrb[40].mxu0 }
 0x14c   : > { %1694 = vst [vmem:[%s2738_s28 + $0x90] sm:$0xff] %v1662_v26  ;;  %v2066_v29 = vpack.c.bf16 %v1270_v27, %v1267_v23  ;;  %v1663_v30 = vadd.f32 %v1599_v25, %v1270_v27  ;;  %v2301_v31 = vpop.f32.mrb[40].mxu1  ;;  %v2190_v32 = vpop.f32.mrb[41].mxu0 }
 0x14d   : > { %v2191_v33 = vadd.f32 %v2190_v32, %v2189_v28  ;;  %v2302_v34 = vpop.f32.mrb[41].mxu1  ;;  %v2192_v35 = vpop.f32.mrb[42].mxu0  ;;  %v1606_v32 = vld [vmem:[%s2731_s24 + $0xd0] sm:$0xff] }
 0x14e   : > { %2106 = vst [vmem:[%s2744_s6 + $0x48] sm:$0xff] %v2066_v29   ;;  %1695 = vst [vmem:[%s2738_s28 + $0x98] sm:$0xff] %v1663_v30  ;;  %v2303_v36 = vadd.f32 %v2302_v34, %v2301_v31  ;;  %v2304_v37 = vpop.f32.mrb[42].mxu1  ;;  %v2193_v38 = vpop.f32.mrb[43].mxu0 }
 0x14f   : > { %v2194_v40 = vadd.f32 %v2193_v38, %v2192_v35  ;;  %v2305_v41 = vpop.f32.mrb[43].mxu1 }
 0x150   : > { %v1275_v42 = vadd.f32 %v2303_v36, %v2191_v33  ;;  %v2306_v43 = vadd.f32 %v2305_v41, %v2304_v37  ;;  %v1607_v37 = vld [vmem:[%s2731_s24 + $0xd8] sm:$0xff] }
 0x152   : > { %v1664_v45 = vadd.f32 %v1600_v39, %v1275_v42  ;;  %v1278_v46 = vadd.f32 %v2306_v43, %v2194_v40 }
 0x153   : > { %v2195_v47 = vpop.f32.mrb[44].mxu0 }
 0x154   : > { %1696 = vst [vmem:[%s2738_s28 + $0xa0] sm:$0xff] %v1664_v45  ;;  %v2071_v48 = vpack.c.bf16 %v1278_v46, %v1275_v42  ;;  %v1665_v49 = vadd.f32 %v1601_v44, %v1278_v46  ;;  %v2307_v50 = vpop.f32.mrb[44].mxu1  ;;  %v2196_v51 = vpop.f32.mrb[45].mxu0 }
 0x155   : > { %v2197_v52 = vadd.f32 %v2196_v51, %v2195_v47  ;;  %v2308_v53 = vpop.f32.mrb[45].mxu1  ;;  %v2198_v54 = vpop.f32.mrb[46].mxu0  ;;  %v1608_v51 = vld [vmem:[%s2731_s24 + $0xe0] sm:$0xff] }
 0x156   : > { %2107 = vst [vmem:[%s2744_s6 + $0x50] sm:$0xff] %v2071_v48   ;;  %1697 = vst [vmem:[%s2738_s28 + $0xa8] sm:$0xff] %v1665_v49  ;;  %v2309_v55 = vadd.f32 %v2308_v53, %v2307_v50  ;;  %v2310_v56 = vpop.f32.mrb[46].mxu1  ;;  %v2199_v57 = vpop.f32.mrb[47].mxu0 }
 0x157   : > { %v2200_v59 = vadd.f32 %v2199_v57, %v2198_v54  ;;  %v2311_v60 = vpop.f32.mrb[47].mxu1 }
 0x158   : > { %v1283_v61 = vadd.f32 %v2309_v55, %v2197_v52  ;;  %v2312_v62 = vadd.f32 %v2311_v60, %v2310_v56  ;;  %v1609_v56 = vld [vmem:[%s2731_s24 + $0xe8] sm:$0xff] }
 0x15a   : > { %v1666_v0 = vadd.f32 %v1602_v58, %v1283_v61  ;;  %v1286_v1 = vadd.f32 %v2312_v62, %v2200_v59 }
 0x15b   : > { %v2201_v2 = vpop.f32.mrb[48].mxu0 }
 0x15c   : > { %1698 = vst [vmem:[%s2738_s28 + $0xb0] sm:$0xff] %v1666_v0  ;;  %v2076_v3 = vpack.c.bf16 %v1286_v1, %v1283_v61  ;;  %v1667_v4 = vadd.f32 %v1603_v63, %v1286_v1  ;;  %v2313_v5 = vpop.f32.mrb[48].mxu1  ;;  %v2202_v6 = vpop.f32.mrb[49].mxu0 }
 0x15d   : > { %v2203_v7 = vadd.f32 %v2202_v6, %v2201_v2  ;;  %v2314_v8 = vpop.f32.mrb[49].mxu1  ;;  %v2204_v9 = vpop.f32.mrb[50].mxu0  ;;  %v1610_v6 = vld [vmem:[%s2731_s24 + $0xf0] sm:$0xff] }
 0x15e   : > { %2108 = vst [vmem:[%s2744_s6 + $0x58] sm:$0xff] %v2076_v3   ;;  %1699 = vst [vmem:[%s2738_s28 + $0xb8] sm:$0xff] %v1667_v4  ;;  %v2315_v10 = vadd.f32 %v2314_v8, %v2313_v5  ;;  %v2316_v11 = vpop.f32.mrb[50].mxu1  ;;  %v2205_v12 = vpop.f32.mrb[51].mxu0 }
 0x15f   : > { %v2206_v14 = vadd.f32 %v2205_v12, %v2204_v9  ;;  %v2317_v15 = vpop.f32.mrb[51].mxu1 }
 0x160   : > { %v1291_v16 = vadd.f32 %v2315_v10, %v2203_v7  ;;  %v2318_v17 = vadd.f32 %v2317_v15, %v2316_v11  ;;  %v1611_v11 = vld [vmem:[%s2731_s24 + $0xf8] sm:$0xff] }
 0x162   : > { %v1668_v19 = vadd.f32 %v1604_v13, %v1291_v16  ;;  %v1294_v20 = vadd.f32 %v2318_v17, %v2206_v14 }
 0x163   : > { %v2207_v21 = vpop.f32.mrb[52].mxu0 }
 0x164   : > { %1700 = vst [vmem:[%s2738_s28 + $0xc0] sm:$0xff] %v1668_v19  ;;  %v2081_v22 = vpack.c.bf16 %v1294_v20, %v1291_v16  ;;  %v1669_v23 = vadd.f32 %v1605_v18, %v1294_v20  ;;  %v2319_v24 = vpop.f32.mrb[52].mxu1  ;;  %v2208_v25 = vpop.f32.mrb[53].mxu0 }
 0x165   : > { %v2209_v26 = vadd.f32 %v2208_v25, %v2207_v21  ;;  %v2320_v27 = vpop.f32.mrb[53].mxu1  ;;  %v2210_v28 = vpop.f32.mrb[54].mxu0 }
 0x166   : > { %2109 = vst [vmem:[%s2744_s6 + $0x60] sm:$0xff] %v2081_v22   ;;  %1701 = vst [vmem:[%s2738_s28 + $0xc8] sm:$0xff] %v1669_v23  ;;  %v2321_v29 = vadd.f32 %v2320_v27, %v2319_v24  ;;  %v2322_v30 = vpop.f32.mrb[54].mxu1  ;;  %v2211_v31 = vpop.f32.mrb[55].mxu0 }
 0x167   : > { %v2212_v33 = vadd.f32 %v2211_v31, %v2210_v28  ;;  %v2323_v34 = vpop.f32.mrb[55].mxu1 }
 0x168   : > { %v1299_v35 = vadd.f32 %v2321_v29, %v2209_v26  ;;  %v2324_v36 = vadd.f32 %v2323_v34, %v2322_v30 }
 0x16a   : > { %v1670_v38 = vadd.f32 %v1606_v32, %v1299_v35  ;;  %v1302_v39 = vadd.f32 %v2324_v36, %v2212_v33 }
 0x16b   : > { %v2213_v40 = vpop.f32.mrb[56].mxu0 }
 0x16c   : > { %1702 = vst [vmem:[%s2738_s28 + $0xd0] sm:$0xff] %v1670_v38  ;;  %v2086_v41 = vpack.c.bf16 %v1302_v39, %v1299_v35  ;;  %v1671_v42 = vadd.f32 %v1607_v37, %v1302_v39  ;;  %v2325_v43 = vpop.f32.mrb[56].mxu1  ;;  %v2214_v44 = vpop.f32.mrb[57].mxu0 }
 0x16d   : > { %v2215_v45 = vadd.f32 %v2214_v44, %v2213_v40  ;;  %v2326_v46 = vpop.f32.mrb[57].mxu1  ;;  %v2216_v47 = vpop.f32.mrb[58].mxu0 }
 0x16e   : > { %2110 = vst [vmem:[%s2744_s6 + $0x68] sm:$0xff] %v2086_v41   ;;  %1703 = vst [vmem:[%s2738_s28 + $0xd8] sm:$0xff] %v1671_v42  ;;  %v2327_v48 = vadd.f32 %v2326_v46, %v2325_v43  ;;  %v2328_v49 = vpop.f32.mrb[58].mxu1  ;;  %v2217_v50 = vpop.f32.mrb[59].mxu0 }
 0x16f   : > { %v2218_v52 = vadd.f32 %v2217_v50, %v2216_v47  ;;  %v2329_v53 = vpop.f32.mrb[59].mxu1 }
 0x170   : > { %v1307_v54 = vadd.f32 %v2327_v48, %v2215_v45  ;;  %v2330_v55 = vadd.f32 %v2329_v53, %v2328_v49 }
 0x172   : > { %v1672_v57 = vadd.f32 %v1608_v51, %v1307_v54  ;;  %v1310_v58 = vadd.f32 %v2330_v55, %v2218_v52 }
 0x173   : > { %v2219_v59 = vpop.f32.mrb[60].mxu0 }
 0x174   : > { %1704 = vst [vmem:[%s2738_s28 + $0xe0] sm:$0xff] %v1672_v57  ;;  %v2091_v60 = vpack.c.bf16 %v1310_v58, %v1307_v54  ;;  %v1673_v61 = vadd.f32 %v1609_v56, %v1310_v58  ;;  %v2331_v62 = vpop.f32.mrb[60].mxu1  ;;  %v2220_v63 = vpop.f32.mrb[61].mxu0 }
 0x175   : > { %v2221_v0 = vadd.f32 %v2220_v63, %v2219_v59  ;;  %v2332_v1 = vpop.f32.mrb[61].mxu1  ;;  %v2222_v2 = vpop.f32.mrb[62].mxu0 }
 0x176   : > { %2111 = vst [vmem:[%s2744_s6 + $0x70] sm:$0xff] %v2091_v60   ;;  %1705 = vst [vmem:[%s2738_s28 + $0xe8] sm:$0xff] %v1673_v61  ;;  %v2333_v3 = vadd.f32 %v2332_v1, %v2331_v62  ;;  %v2334_v4 = vpop.f32.mrb[62].mxu1  ;;  %v2223_v5 = vpop.f32.mrb[63].mxu0 }
 0x177   : > { %v2224_v7 = vadd.f32 %v2223_v5, %v2222_v2  ;;  %v2335_v8 = vpop.f32.mrb[63].mxu1 }
 0x178   : > { %v1315_v9 = vadd.f32 %v2333_v3, %v2221_v0  ;;  %v2336_v10 = vadd.f32 %v2335_v8, %v2334_v4 }
 0x17a   : > { %v1674_v12 = vadd.f32 %v1610_v6, %v1315_v9  ;;  %v1318_v13 = vadd.f32 %v2336_v10, %v2224_v7 }
 0x17c   : > { %1706 = vst [vmem:[%s2738_s28 + $0xf0] sm:$0xff] %v1674_v12  ;;  %v2096_v14 = vpack.c.bf16 %v1318_v13, %v1315_v9  ;;  %v1675_v15 = vadd.f32 %v1611_v11, %v1318_v13 }
 0x17e   : > { %2112 = vst [vmem:[%s2744_s6 + $0x78] sm:$0xff] %v2096_v14   ;;  %1707 = vst [vmem:[%s2738_s28 + $0xf8] sm:$0xff] %v1675_v15 }
 0x17f PF: > { %s15_s17 = sadd.s32 1, %s2511_s17   ;;  %s2838_s15 = smov %s2507_s16 }
 0x180   : > { %p12_p5 = scmp.ge.s32.totalorder %s15_s17, 4   ;;  %s2839_s16 = smov %s2841_s18 }
 0x182   :  { %14 = sbr.rel (!%p12_p5) target bundleno = 2 (0x2), region = 88 }

// kernel: lightgcn_forward.6
= control target key start
LH: loop header
LB: loop body
LE: loop exit
PB: predicated region body
PF: predicated region fallthrough
CT: control target
= control target key end

     0   :  { %10 = vsyncpa [#allocation4], 0  ;;  %s3027_s0 = inlined_call_operand.vmem [shape: bf16[512,512], index: 0, kind: input, shape index: {}]   ;;  %s3028_s1 = inlined_call_operand.vmem [shape: bf16[512,128], index: 1, kind: input, shape index: {}]   ;;  %s3029_s2 = inlined_call_operand.vmem [shape: f32[512,128], index: 2, kind: input, shape index: {}]   ;;  %s3030_s3 = inlined_call_operand.hbm [shape: bf16[512,128], index: 3, kind: output, shape index: {0}]   ;;  %s3031_s4 = inlined_call_operand.vmem [shape: f32[512,128], index: 4, kind: output, shape index: {1}]  }
   0x1   :  { %12 = vsyncpa [#allocation4 + $0x1], 0  ;;  %s2650_s15 = smov 0   ;;  %s2652_s16 = smov 0  }
   0x2   :  { %s2654_s17 = smov 0   ;;  %s2656_s18 = smov 0  }
   0x3   :  { %s2658_s19 = smov 0   ;;  %s2660_s20 = smov 0  }
   0x4 LB: > { %s1857_s21 = sadd.s32 4294967295, %s2620_s20   ;;  %s1858_s22 = sadd.s32 4294967294, %s2620_s20   ;;  %s2620_s20 = sphi %s2660_s20, %s18_s20   ;;  %s2616_s19 = sphi %s2658_s19, %s3038_s19   ;;  %s2612_s18 = sphi %s2656_s18, %s3037_s18   ;;  %s2608_s17 = sphi %s2654_s17, %s3036_s17   ;;  %s2604_s16 = sphi %s2652_s16, %s3035_s16   ;;  %s2600_s15 = sphi %s2650_s15, %s3034_s15  }
   0x5   : > { %s30_s23 = sadd.s32 1, %s2616_s19  ;;  %s117_s24 = sadd.s32 1, %s2608_s17 }
   0x6   : > { %p32_p0 = scmp.ge.s32.totalorder %s30_s23, 2  ;;  %p127_p1 = scmp.ne.s32.totalorder %s2608_s17, %s2604_s16 }
   0x7   : > { %p128_p2 = scmp.eq.s32.totalorder %s1857_s21, 1  ;;  %p133_p3 = scmp.ne.s32.totalorder %s2604_s16, %s2600_s15 }
   0x8   : > { %s3040_s23 = smov (%p32_p0, %s30_s23), 0  ;;  %p134_p5 = scmp.eq.s32.totalorder %s1858_s22, 1 }
   0x9   : > { %p2690_p4 = por %p128_p2, %p127_p1  ;;  %s114_s26 = ssub.s32 %s2616_s19, %s3040_s23 }
   0xa   : > { %p1862_p6 = scmp.ge.s32.totalorder %s2620_s20, 1  ;;  %p115_p7 = scmp.eq.s32.totalorder %s114_s26, 0 }
   0xb   : > { %p2697_p8 = por %p134_p5, %p133_p3  ;;  %p211_p9 = scmp.lt.s32.totalorder %s2620_s20, 3 }
   0xc   : > { %s2703_s28 = scalar_select %p115_p7, %s2608_s17, %s117_s24  }
   0xd   : > { %p212_p10 = pnand %p1862_p6, %p211_p9 }
   0xe   : > { %v2414_v0 = vld [vmem:[%s3028_s1 + $0x40] sm:$0xff] (!%p212_p10)   ;;  %v2418_v4 = vld [vmem:[%s3028_s1 + $0x48] sm:$0xff] (!%p212_p10)   ;;  %v2422_v8 = vld [vmem:[%s3028_s1 + $0x50] sm:$0xff] (!%p212_p10)   ;;  %s1864_s29 = sshll.u32 (!%p212_p10), %s2612_s18, 5  ;;  %s247_s14 = sand.u32 (!%p212_p10), 1, %s2604_s16  }
   0xf   : > { %215 = sbr.rel (%p212_p10) target bundleno = 405 (0x195), region = 32  ;;  %v2415_v1 = vld [vmem:[%s3028_s1 + $0xc0] sm:$0xff] (!%p212_p10)   ;;  %2133 = vmatprep.subr.bf16.mxu0 (!%p212_p10), %v2414_v0  ;;  %v2419_v5 = vld [vmem:[%s3028_s1 + $0xc8] sm:$0xff] (!%p212_p10)   ;;  %v2423_v9 = vld [vmem:[%s3028_s1 + $0xd0] sm:$0xff] (!%p212_p10)   ;;  %p259_p11 = scmp.lt.s32.totalorder (!%p212_p10), %s1864_s29, 63 }
  0x10   : > { %v2416_v2 = vld [vmem:[%s3028_s1] sm:$0xff] (!%p212_p10)   ;;  %2245 = vmatprep.subr.bf16.mxu1 (!%p212_p10), %v2415_v1  ;;  %v2420_v6 = vld [vmem:[%s3028_s1 + $0x8] sm:$0xff] (!%p212_p10)   ;;  %v2424_v10 = vld [vmem:[%s3028_s1 + $0x10] sm:$0xff] (!%p212_p10)   ;;  %s2037_s30 = sshll.u32 (!%p212_p10), %s2612_s18, 11  ;;  %s2981_s18 = scalar_lea.sflag (!%p212_p10), [#allocation4], %s247_s14 }
  0x11   : > { %v2417_v3 = vld [vmem:[%s3028_s1 + $0x80] sm:$0xff] (!%p212_p10)   ;;  %2134 = vmatpush3.bf16.msra.mxu0 (!%p212_p10), %v2416_v2  ;;  %v2421_v7 = vld [vmem:[%s3028_s1 + $0x88] sm:$0xff] (!%p212_p10)   ;;  %v2425_v11 = vld [vmem:[%s3028_s1 + $0x90] sm:$0xff] (!%p212_p10)   ;;  %s2972_s8 = scalar_lea.hbm (!%p212_p10), %s3030_s3, %s2037_s30 }
  0x12   : > { %2246 = vmatpush3.bf16.msra.mxu1 (!%p212_p10), %v2417_v3  ;;  %2135 = vmatprep.subr.bf16.mxu0 (!%p212_p10), %v2418_v4  ;;  %v2426_v12 = vld [vmem:[%s3028_s1 + $0x58] sm:$0xff] (!%p212_p10)   ;;  %v2430_v16 = vld [vmem:[%s3028_s1 + $0x60] sm:$0xff] (!%p212_p10)   ;;  %v2434_v20 = vld [vmem:[%s3028_s1 + $0x68] sm:$0xff] (!%p212_p10)  }
  0x13   : > { %2247 = vmatprep.subr.bf16.mxu1 (!%p212_p10), %v2419_v5  ;;  %v2427_v13 = vld [vmem:[%s3028_s1 + $0xd8] sm:$0xff] (!%p212_p10)   ;;  %v2431_v17 = vld [vmem:[%s3028_s1 + $0xe0] sm:$0xff] (!%p212_p10)   ;;  %v2435_v21 = vld [vmem:[%s3028_s1 + $0xe8] sm:$0xff] (!%p212_p10)  }
  0x14   : > { %v2428_v14 = vld [vmem:[%s3028_s1 + $0x18] sm:$0xff] (!%p212_p10)   ;;  %v2432_v18 = vld [vmem:[%s3028_s1 + $0x20] sm:$0xff] (!%p212_p10)   ;;  %v2436_v22 = vld [vmem:[%s3028_s1 + $0x28] sm:$0xff] (!%p212_p10)  }
  0x15   : > { %2136 = vmatpush3.bf16.msra.mxu0 (!%p212_p10), %v2420_v6  ;;  %v2429_v15 = vld [vmem:[%s3028_s1 + $0x98] sm:$0xff] (!%p212_p10)   ;;  %v2433_v19 = vld [vmem:[%s3028_s1 + $0xa0] sm:$0xff] (!%p212_p10)   ;;  %v2437_v23 = vld [vmem:[%s3028_s1 + $0xa8] sm:$0xff] (!%p212_p10)  }
  0x16   : > { %2248 = vmatpush3.bf16.msra.mxu1 %v2421_v7  ;;  %2137 = vmatprep.subr.bf16.mxu0 %v2422_v8  ;;  %s3042_s29 = smov (!%p259_p11, %s1864_s29), 63  ;;  %v2438_v24 = vld [vmem:[%s3028_s1 + $0x70] sm:$0xff]   ;;  %v2442_v28 = vld [vmem:[%s3028_s1 + $0x78] sm:$0xff]  }
  0x17   : > { %2249 = vmatprep.subr.bf16.mxu1 %v2423_v9  ;;  %v2439_v25 = vld [vmem:[%s3028_s1 + $0xf0] sm:$0xff]   ;;  %s2004_s11 = sshll.u32 %s3042_s29, 4  ;;  %v2443_v29 = vld [vmem:[%s3028_s1 + $0xf8] sm:$0xff]   ;;  %s1868_s10 = sshll.u32 %s3042_s29, 3 }
  0x18   : > { %v2440_v26 = vld [vmem:[%s3028_s1 + $0x30] sm:$0xff]   ;;  %s2802_s5 = scalar_lea.vmem %s3027_s0, %s2004_s11  ;;  %v2444_v30 = vld [vmem:[%s3028_s1 + $0x38] sm:$0xff]   ;;  %s2878_s13 = scalar_lea.vmem %s3029_s2, %s1868_s10 }
  0x19   : > { %2138 = vmatpush3.bf16.msra.mxu0 %v2424_v10  ;;  %v2441_v27 = vld [vmem:[%s3028_s1 + $0xb0] sm:$0xff]   ;;  %v2445_v31 = vld [vmem:[%s3028_s1 + $0xb8] sm:$0xff]   ;;  %s1863_s29 = sshll.u32 %s247_s14, 7  ;;  %s2887_s24 = scalar_lea.vmem %s3031_s4, %s1868_s10 }
  0x1a   : > { %2250 = vmatpush3.bf16.msra.mxu1 %v2425_v11  ;;  %2139 = vmatprep.subr.bf16.mxu0 %v2426_v12  ;;  %v2446_v32 = vld [vmem:[%s2802_s5] ss:$16 sps:$4 sm:$0xff]   ;;  %v2448_v33 = vld [vmem:[%s2802_s5 + $0x4] ss:$16 sps:$4 sm:$0xff]   ;;  %v2449_v34 = vld [vmem:[%s2802_s5 + $0x8] ss:$16 sps:$4 sm:$0xff]  }
  0x1b   : > { %2251 = vmatprep.subr.bf16.mxu1 %v2427_v13  ;;  %v2451_v35 = vld [vmem:[%s2802_s5 + $0xc] ss:$16 sps:$4 sm:$0xff]   ;;  %1029 = vmatprep.mubr.bf16.mxu0 %v2448_v33  ;;  %v2452_v36 = vld [vmem:[%s2802_s5 + $0x24] ss:$16 sps:$4 sm:$0xff]   ;;  %v2456_v38 = vld [vmem:[%s2802_s5 + $0x20] ss:$16 sps:$4 sm:$0xff]  }
  0x1c   : > { %1190 = vmatprep.mubr.bf16.mxu1 %v2451_v35  ;;  %v2454_v37 = vld [vmem:[%s2802_s5 + $0x2c] ss:$16 sps:$4 sm:$0xff]   ;;  %v2457_v39 = vld [vmem:[%s2802_s5 + $0x28] ss:$16 sps:$4 sm:$0xff]   ;;  %v2458_v40 = vld [vmem:[%s2802_s5 + $0x44] ss:$16 sps:$4 sm:$0xff]  }
  0x1d   : > { %2140 = vmatpush3.bf16.msra.mxu0 %v2428_v14  ;;  %v2460_v41 = vld [vmem:[%s2802_s5 + $0x4c] ss:$16 sps:$4 sm:$0xff]   ;;  %v2462_v42 = vld [vmem:[%s2802_s5 + $0x40] ss:$16 sps:$4 sm:$0xff]   ;;  %v2463_v43 = vld [vmem:[%s2802_s5 + $0x48] ss:$16 sps:$4 sm:$0xff]  }
  0x1e   : > { %2252 = vmatpush3.bf16.msra.mxu1 %v2429_v15  ;;  %2141 = vmatprep.subr.bf16.mxu0 %v2430_v16  ;;  %v2464_v44 = vld [vmem:[%s2802_s5 + $0x64] ss:$16 sps:$4 sm:$0xff]   ;;  %v2466_v45 = vld [vmem:[%s2802_s5 + $0x6c] ss:$16 sps:$4 sm:$0xff]   ;;  %v2468_v46 = vld [vmem:[%s2802_s5 + $0x60] ss:$16 sps:$4 sm:$0xff]  }
  0x1f   : > { %2253 = vmatprep.subr.bf16.mxu1 %v2431_v17  ;;  %v2469_v47 = vld [vmem:[%s2802_s5 + $0x68] ss:$16 sps:$4 sm:$0xff]   ;;  %v2470_v48 = vld [vmem:[%s2802_s5 + $0x84] ss:$16 sps:$4 sm:$0xff]   ;;  %v2472_v49 = vld [vmem:[%s2802_s5 + $0x8c] ss:$16 sps:$4 sm:$0xff]  }
  0x20   : > { %v2474_v50 = vld [vmem:[%s2802_s5 + $0x80] ss:$16 sps:$4 sm:$0xff]   ;;  %v2475_v51 = vld [vmem:[%s2802_s5 + $0x88] ss:$16 sps:$4 sm:$0xff]   ;;  %v2476_v52 = vld [vmem:[%s2802_s5 + $0xa4] ss:$16 sps:$4 sm:$0xff]  }
  0x21   : > { %2142 = vmatpush3.bf16.msra.mxu0 %v2432_v18  ;;  %v2478_v53 = vld [vmem:[%s2802_s5 + $0xac] ss:$16 sps:$4 sm:$0xff]   ;;  %v2480_v54 = vld [vmem:[%s2802_s5 + $0xa0] ss:$16 sps:$4 sm:$0xff]   ;;  %v2481_v55 = vld [vmem:[%s2802_s5 + $0xa8] ss:$16 sps:$4 sm:$0xff]  }
  0x22   : > { %2254 = vmatpush3.bf16.msra.mxu1 %v2433_v19  ;;  %2143 = vmatprep.subr.bf16.mxu0 %v2434_v20  ;;  %v2482_v56 = vld [vmem:[%s2802_s5 + $0xc4] ss:$16 sps:$4 sm:$0xff]   ;;  %v2484_v57 = vld [vmem:[%s2802_s5 + $0xcc] ss:$16 sps:$4 sm:$0xff]   ;;  %v2486_v58 = vld [vmem:[%s2802_s5 + $0xc0] ss:$16 sps:$4 sm:$0xff]  }
  0x23   : > { %2255 = vmatprep.subr.bf16.mxu1 %v2435_v21  ;;  %v2487_v59 = vld [vmem:[%s2802_s5 + $0xc8] ss:$16 sps:$4 sm:$0xff]   ;;  %v2488_v60 = vld [vmem:[%s2802_s5 + $0xe4] ss:$16 sps:$4 sm:$0xff]   ;;  %v2490_v61 = vld [vmem:[%s2802_s5 + $0xec] ss:$16 sps:$4 sm:$0xff]  }
  0x24   : > { %v2492_v62 = vld [vmem:[%s2802_s5 + $0xe0] ss:$16 sps:$4 sm:$0xff]   ;;  %v2493_v63 = vld [vmem:[%s2802_s5 + $0xe8] ss:$16 sps:$4 sm:$0xff]   ;;  %v2494_v0 = vld [vmem:[%s2802_s5 + $0x104] ss:$16 sps:$4 sm:$0xff]  }
  0x25   : > { %2144 = vmatpush3.bf16.msra.mxu0 %v2436_v22  ;;  %v2496_v1 = vld [vmem:[%s2802_s5 + $0x10c] ss:$16 sps:$4 sm:$0xff]   ;;  %v2498_v2 = vld [vmem:[%s2802_s5 + $0x100] ss:$16 sps:$4 sm:$0xff]   ;;  %v2499_v3 = vld [vmem:[%s2802_s5 + $0x108] ss:$16 sps:$4 sm:$0xff]  }
  0x26   : > { %2256 = vmatpush3.bf16.msra.mxu1 %v2437_v23  ;;  %2145 = vmatprep.subr.bf16.mxu0 %v2438_v24  ;;  %v2500_v4 = vld [vmem:[%s2802_s5 + $0x124] ss:$16 sps:$4 sm:$0xff]   ;;  %v2502_v5 = vld [vmem:[%s2802_s5 + $0x12c] ss:$16 sps:$4 sm:$0xff]   ;;  %v2504_v6 = vld [vmem:[%s2802_s5 + $0x120] ss:$16 sps:$4 sm:$0xff]  }
  0x27   : > { %2257 = vmatprep.subr.bf16.mxu1 %v2439_v25  ;;  %v2505_v7 = vld [vmem:[%s2802_s5 + $0x128] ss:$16 sps:$4 sm:$0xff]   ;;  %v2506_v8 = vld [vmem:[%s2802_s5 + $0x144] ss:$16 sps:$4 sm:$0xff]   ;;  %v2508_v9 = vld [vmem:[%s2802_s5 + $0x14c] ss:$16 sps:$4 sm:$0xff]  }
  0x28   : > { %v2510_v10 = vld [vmem:[%s2802_s5 + $0x140] ss:$16 sps:$4 sm:$0xff]   ;;  %v2511_v11 = vld [vmem:[%s2802_s5 + $0x148] ss:$16 sps:$4 sm:$0xff]   ;;  %v2512_v12 = vld [vmem:[%s2802_s5 + $0x164] ss:$16 sps:$4 sm:$0xff]  }
  0x29   : > { %2146 = vmatpush3.bf16.msra.mxu0 %v2440_v26  ;;  %v2514_v13 = vld [vmem:[%s2802_s5 + $0x16c] ss:$16 sps:$4 sm:$0xff]   ;;  %v2516_v14 = vld [vmem:[%s2802_s5 + $0x160] ss:$16 sps:$4 sm:$0xff]   ;;  %v2517_v15 = vld [vmem:[%s2802_s5 + $0x168] ss:$16 sps:$4 sm:$0xff]  }
  0x2a   : > { %2258 = vmatpush3.bf16.msra.mxu1 %v2441_v27  ;;  %2147 = vmatprep.subr.bf16.mxu0 %v2442_v28  ;;  %v2518_v16 = vld [vmem:[%s2802_s5 + $0x184] ss:$16 sps:$4 sm:$0xff]   ;;  %v2520_v17 = vld [vmem:[%s2802_s5 + $0x18c] ss:$16 sps:$4 sm:$0xff]   ;;  %v2522_v18 = vld [vmem:[%s2802_s5 + $0x180] ss:$16 sps:$4 sm:$0xff]  }
  0x2b   : > { %2259 = vmatprep.subr.bf16.mxu1 %v2443_v29  ;;  %v2523_v19 = vld [vmem:[%s2802_s5 + $0x188] ss:$16 sps:$4 sm:$0xff]   ;;  %v2524_v20 = vld [vmem:[%s2802_s5 + $0x1a4] ss:$16 sps:$4 sm:$0xff]   ;;  %v2526_v21 = vld [vmem:[%s2802_s5 + $0x1ac] ss:$16 sps:$4 sm:$0xff]  }
  0x2c   : > { %v2528_v22 = vld [vmem:[%s2802_s5 + $0x1a0] ss:$16 sps:$4 sm:$0xff]   ;;  %v2529_v23 = vld [vmem:[%s2802_s5 + $0x1a8] ss:$16 sps:$4 sm:$0xff]   ;;  %v2530_v24 = vld [vmem:[%s2802_s5 + $0x1c4] ss:$16 sps:$4 sm:$0xff]  }
  0x2d   : > { %2148 = vmatpush3.bf16.msra.mxu0 %v2444_v30  ;;  %v2532_v25 = vld [vmem:[%s2802_s5 + $0x1cc] ss:$16 sps:$4 sm:$0xff]   ;;  %v2534_v26 = vld [vmem:[%s2802_s5 + $0x1c0] ss:$16 sps:$4 sm:$0xff]   ;;  %v2535_v27 = vld [vmem:[%s2802_s5 + $0x1c8] ss:$16 sps:$4 sm:$0xff]  }
  0x2e   : > { %2260 = vmatpush3.bf16.msra.mxu1 %v2445_v31  ;;  %v2536_v28 = vld [vmem:[%s2802_s5 + $0x1e4] ss:$16 sps:$4 sm:$0xff]   ;;  %v2538_v29 = vld [vmem:[%s2802_s5 + $0x1ec] ss:$16 sps:$4 sm:$0xff]   ;;  %v2540_v30 = vld [vmem:[%s2802_s5 + $0x1e0] ss:$16 sps:$4 sm:$0xff]  }
  0x2f   : > { %v2541_v31 = vld [vmem:[%s2802_s5 + $0x1e8] ss:$16 sps:$4 sm:$0xff]   ;;  %s2891_s26 = scalar_lea.vmem [#allocation3], %s1863_s29  ;;  %s2622_s10 = smov [#allocation3]  }
  0x30   : > { %1030 = vmatmul.mubr.bf16.vlgmr.msra.gmra.mrb[0].mxu0 %v2446_v32  ;;  %s1725_s5 = sshll.u32 %s2891_s26, 4  ;;  %s2546_s11 = sshll.u32 %s2622_s10, 4  ;;  %s2974_s5 = int_to_ptr.vmem [resolvable:$true] %s1725_s5  ;;  %s2547_s11 = int_to_ptr.vmem [resolvable:$false] %s2546_s11 }
  0x31   : > { %1191 = vmatmul.mubr.bf16.vlgmr.msra.gmra.mrb[0].mxu1 %v2449_v34  ;;  %1037 = vmatprep.mubr.bf16.mxu0 %v2452_v36  ;;  %s2542_s9 = scalar_lea.vmem %s2974_s5, 2048  ;;  %s2548_s12 = scalar_lea.vmem %s2547_s11, 4096 }
  0x32   : > { %1198 = vmatprep.mubr.bf16.mxu1 %v2454_v37  ;;  %p2543_p12 = scmp.ne.s32.totalorder %s2974_s5, %s2542_s9  ;;  %p2549_p1 = scmp.lt.s32.totalorder %s2974_s5, %s2547_s11 }
  0x33   : > { %p2550_p2 = scmp.lt.s32.totalorder %s2548_s12, %s2542_s9 }
  0x34   : > { %p2544_p13 = pnand %p2543_p12, %p2690_p4 }
  0x35   : > { %p2551_p3 = por %p2550_p2, %p2549_p1 }
  0x36   : > { %p2545_p0 = pneg %p2544_p13 }
  0x38   : > { %1038 = vmatmul.mubr.bf16.gmra.mrb[4].mxu0 %v2456_v38  ;;  %p2552_p5 = pnand %p2551_p3, %p2545_p0 }
  0x39   : > { %1199 = vmatmul.mubr.bf16.gmra.mrb[4].mxu1 %v2457_v39  ;;  %1045 = vmatprep.mubr.bf16.mxu0 %v2458_v40 }
  0x3a   : > { %1206 = vmatprep.mubr.bf16.mxu1 %v2460_v41  ;;  %v1578_v41 = vld [vmem:[%s2878_s13] sm:$0xff] }
  0x40   : > { %1046 = vmatmul.mubr.bf16.gmra.mrb[8].mxu0 %v2462_v42 }
  0x41   : > { %1207 = vmatmul.mubr.bf16.gmra.mrb[8].mxu1 %v2463_v43  ;;  %1053 = vmatprep.mubr.bf16.mxu0 %v2464_v44 }
  0x42   : > { %1214 = vmatprep.mubr.bf16.mxu1 %v2466_v45 }
  0x48   : > { %1054 = vmatmul.mubr.bf16.gmra.mrb[12].mxu0 %v2468_v46  ;;  %v1579_v46 = vld [vmem:[%s2878_s13 + $0x8] sm:$0xff] }
  0x49   : > { %1215 = vmatmul.mubr.bf16.gmra.mrb[12].mxu1 %v2469_v47  ;;  %1061 = vmatprep.mubr.bf16.mxu0 %v2470_v48 }
  0x4a   : > { %1222 = vmatprep.mubr.bf16.mxu1 %v2472_v49 }
  0x50   : > { %1062 = vmatmul.mubr.bf16.gmra.mrb[16].mxu0 %v2474_v50 }
  0x51   : > { %1223 = vmatmul.mubr.bf16.gmra.mrb[16].mxu1 %v2475_v51  ;;  %1069 = vmatprep.mubr.bf16.mxu0 %v2476_v52 }
  0x52   : > { %1230 = vmatprep.mubr.bf16.mxu1 %v2478_v53 }
  0x58   : > { %1070 = vmatmul.mubr.bf16.gmra.mrb[20].mxu0 %v2480_v54 }
  0x59   : > { %1231 = vmatmul.mubr.bf16.gmra.mrb[20].mxu1 %v2481_v55  ;;  %1077 = vmatprep.mubr.bf16.mxu0 %v2482_v56 }
  0x5a   : > { %1238 = vmatprep.mubr.bf16.mxu1 %v2484_v57 }
  0x60   : > { %1078 = vmatmul.mubr.bf16.gmra.mrb[24].mxu0 %v2486_v58 }
  0x61   : > { %1239 = vmatmul.mubr.bf16.gmra.mrb[24].mxu1 %v2487_v59  ;;  %1085 = vmatprep.mubr.bf16.mxu0 %v2488_v60  ;;  %v1580_v60 = vld [vmem:[%s2878_s13 + $0x10] sm:$0xff] }
  0x62   : > { %1246 = vmatprep.mubr.bf16.mxu1 %v2490_v61 }
  0x68   : > { %1086 = vmatmul.mubr.bf16.gmra.mrb[28].mxu0 %v2492_v62 }
  0x69   : > { %1247 = vmatmul.mubr.bf16.gmra.mrb[28].mxu1 %v2493_v63  ;;  %1093 = vmatprep.mubr.bf16.mxu0 %v2494_v0 }
  0x6a   : > { %1254 = vmatprep.mubr.bf16.mxu1 %v2496_v1  ;;  %v1581_v1 = vld [vmem:[%s2878_s13 + $0x18] sm:$0xff] }
  0x70   : > { %1094 = vmatmul.mubr.bf16.gmra.mrb[32].mxu0 %v2498_v2 }
  0x71   : > { %1255 = vmatmul.mubr.bf16.gmra.mrb[32].mxu1 %v2499_v3  ;;  %1101 = vmatprep.mubr.bf16.mxu0 %v2500_v4 }
  0x72   : > { %1262 = vmatprep.mubr.bf16.mxu1 %v2502_v5 }
  0x78   : > { %1102 = vmatmul.mubr.bf16.gmra.mrb[36].mxu0 %v2504_v6 }
  0x79   : > { %1263 = vmatmul.mubr.bf16.gmra.mrb[36].mxu1 %v2505_v7  ;;  %1109 = vmatprep.mubr.bf16.mxu0 %v2506_v8 }
  0x7a   : > { %1270 = vmatprep.mubr.bf16.mxu1 %v2508_v9 }
  0x80   : > { %1110 = vmatmul.mubr.bf16.gmra.mrb[40].mxu0 %v2510_v10 }
  0x81   : > { %1271 = vmatmul.mubr.bf16.gmra.mrb[40].mxu1 %v2511_v11  ;;  %1117 = vmatprep.mubr.bf16.mxu0 %v2512_v12 }
  0x82   : > { %1278 = vmatprep.mubr.bf16.mxu1 %v2514_v13 }
  0x88   : > { %1118 = vmatmul.mubr.bf16.gmra.mrb[44].mxu0 %v2516_v14 }
  0x89   : > { %1279 = vmatmul.mubr.bf16.gmra.mrb[44].mxu1 %v2517_v15  ;;  %1125 = vmatprep.mubr.bf16.mxu0 %v2518_v16  ;;  %v1582_v15 = vld [vmem:[%s2878_s13 + $0x20] sm:$0xff] }
  0x8a   : > { %1286 = vmatprep.mubr.bf16.mxu1 %v2520_v17 }
  0x90   : > { %1126 = vmatmul.mubr.bf16.gmra.mrb[48].mxu0 %v2522_v18 }
  0x91   : > { %1287 = vmatmul.mubr.bf16.gmra.mrb[48].mxu1 %v2523_v19  ;;  %1133 = vmatprep.mubr.bf16.mxu0 %v2524_v20  ;;  %v1583_v20 = vld [vmem:[%s2878_s13 + $0x28] sm:$0xff] }
  0x92   : > { %1294 = vmatprep.mubr.bf16.mxu1 %v2526_v21 }
  0x98   : > { %1134 = vmatmul.mubr.bf16.gmra.mrb[52].mxu0 %v2528_v22 }
  0x99   : > { %1295 = vmatmul.mubr.bf16.gmra.mrb[52].mxu1 %v2529_v23  ;;  %1141 = vmatprep.mubr.bf16.mxu0 %v2530_v24 }
  0x9a   : > { %1302 = vmatprep.mubr.bf16.mxu1 %v2532_v25 }
  0xa0   : > { %1142 = vmatmul.mubr.bf16.gmra.mrb[56].mxu0 %v2534_v26 }
  0xa1   : > { %1303 = vmatmul.mubr.bf16.gmra.mrb[56].mxu1 %v2535_v27  ;;  %1149 = vmatprep.mubr.bf16.mxu0 %v2536_v28 }
  0xa2   : > { %1310 = vmatprep.mubr.bf16.mxu1 %v2538_v29 }
  0xa8   : > { %1150 = vmatmul.mubr.bf16.gmra.mrb[60].mxu0 %v2540_v30 }
  0xa9   : > { %1311 = vmatmul.mubr.bf16.gmra.mrb[60].mxu1 %v2541_v31 }
 0x103   : > { %v2149_v32 = vpop.f32.mrb[0].mxu0 }
 0x104   : > { %v2261_v33 = vpop.f32.mrb[0].mxu1  ;;  %v2150_v34 = vpop.f32.mrb[1].mxu0 }
 0x105   : > { %v2151_v35 = vadd.f32 %v2150_v34, %v2149_v32  ;;  %v2262_v36 = vpop.f32.mrb[1].mxu1  ;;  %v2152_v37 = vpop.f32.mrb[2].mxu0  ;;  %v1584_v34 = vld [vmem:[%s2878_s13 + $0x30] sm:$0xff] }
 0x106   : > { %v2263_v38 = vadd.f32 %v2262_v36, %v2261_v33  ;;  %v2264_v39 = vpop.f32.mrb[2].mxu1  ;;  %v2153_v40 = vpop.f32.mrb[3].mxu0 }
 0x107   : > { %v2154_v42 = vadd.f32 %v2153_v40, %v2152_v37  ;;  %v2265_v43 = vpop.f32.mrb[3].mxu1 }
 0x108   : > { %v1193_v44 = vadd.f32 %v2263_v38, %v2151_v35  ;;  %v2266_v45 = vadd.f32 %v2265_v43, %v2264_v39  ;;  %v1585_v39 = vld [vmem:[%s2878_s13 + $0x38] sm:$0xff] }
 0x10a   : > { %v1642_v47 = vadd.f32 %v1578_v41, %v1193_v44  ;;  %v1196_v48 = vadd.f32 %v2266_v45, %v2154_v42 }
 0x10b   : > { %v2155_v49 = vpop.f32.mrb[4].mxu0 }
 0x10c   : > { %1674 = vst [vmem:[%s2887_s24] sm:$0xff] %v1642_v47  ;;  %v2041_v50 = vpack.c.bf16 %v1196_v48, %v1193_v44  ;;  %v1643_v51 = vadd.f32 %v1579_v46, %v1196_v48  ;;  %v2267_v52 = vpop.f32.mrb[4].mxu1  ;;  %v2156_v53 = vpop.f32.mrb[5].mxu0 }
 0x10d   : > { %v2157_v54 = vadd.f32 %v2156_v53, %v2155_v49  ;;  %v2268_v55 = vpop.f32.mrb[5].mxu1  ;;  %v2158_v56 = vpop.f32.mrb[6].mxu0  ;;  %v1586_v53 = vld [vmem:[%s2878_s13 + $0x40] sm:$0xff] }
 0x10e   : > { %2042 = vst [vmem:[%s2891_s26] sm:$0xff] %v2041_v50   ;;  %1675 = vst [vmem:[%s2887_s24 + $0x8] sm:$0xff] %v1643_v51  ;;  %v2269_v57 = vadd.f32 %v2268_v55, %v2267_v52  ;;  %v2270_v58 = vpop.f32.mrb[6].mxu1  ;;  %v2159_v59 = vpop.f32.mrb[7].mxu0 }
 0x10f   : > { %v2160_v61 = vadd.f32 %v2159_v59, %v2158_v56  ;;  %v2271_v62 = vpop.f32.mrb[7].mxu1 }
 0x110   : > { %v1201_v63 = vadd.f32 %v2269_v57, %v2157_v54  ;;  %v2272_v0 = vadd.f32 %v2271_v62, %v2270_v58  ;;  %v1587_v58 = vld [vmem:[%s2878_s13 + $0x48] sm:$0xff] }
 0x112   : > { %v1644_v2 = vadd.f32 %v1580_v60, %v1201_v63  ;;  %v1204_v3 = vadd.f32 %v2272_v0, %v2160_v61 }
 0x113   : > { %v2161_v4 = vpop.f32.mrb[8].mxu0 }
 0x114   : > { %1676 = vst [vmem:[%s2887_s24 + $0x10] sm:$0xff] %v1644_v2  ;;  %v2046_v5 = vpack.c.bf16 %v1204_v3, %v1201_v63  ;;  %v1645_v6 = vadd.f32 %v1581_v1, %v1204_v3  ;;  %v2273_v7 = vpop.f32.mrb[8].mxu1  ;;  %v2162_v8 = vpop.f32.mrb[9].mxu0 }
 0x115   : > { %v2163_v9 = vadd.f32 %v2162_v8, %v2161_v4  ;;  %v2274_v10 = vpop.f32.mrb[9].mxu1  ;;  %v2164_v11 = vpop.f32.mrb[10].mxu0  ;;  %v1588_v8 = vld [vmem:[%s2878_s13 + $0x50] sm:$0xff] }
 0x116   : > { %2118 = vst [vmem:[%s2891_s26 + $0x8] sm:$0xff] %v2046_v5   ;;  %1677 = vst [vmem:[%s2887_s24 + $0x18] sm:$0xff] %v1645_v6  ;;  %v2275_v12 = vadd.f32 %v2274_v10, %v2273_v7  ;;  %v2276_v13 = vpop.f32.mrb[10].mxu1  ;;  %v2165_v14 = vpop.f32.mrb[11].mxu0 }
 0x117   : > { %v2166_v16 = vadd.f32 %v2165_v14, %v2164_v11  ;;  %v2277_v17 = vpop.f32.mrb[11].mxu1 }
 0x118   : > { %v1209_v18 = vadd.f32 %v2275_v12, %v2163_v9  ;;  %v2278_v19 = vadd.f32 %v2277_v17, %v2276_v13  ;;  %v1589_v13 = vld [vmem:[%s2878_s13 + $0x58] sm:$0xff] }
 0x11a   : > { %v1646_v21 = vadd.f32 %v1582_v15, %v1209_v18  ;;  %v1212_v22 = vadd.f32 %v2278_v19, %v2166_v16 }
 0x11b   : > { %v2167_v23 = vpop.f32.mrb[12].mxu0 }
 0x11c   : > { %1678 = vst [vmem:[%s2887_s24 + $0x20] sm:$0xff] %v1646_v21  ;;  %v2051_v24 = vpack.c.bf16 %v1212_v22, %v1209_v18  ;;  %v1647_v25 = vadd.f32 %v1583_v20, %v1212_v22  ;;  %v2279_v26 = vpop.f32.mrb[12].mxu1  ;;  %v2168_v27 = vpop.f32.mrb[13].mxu0 }
 0x11d   : > { %v2169_v28 = vadd.f32 %v2168_v27, %v2167_v23  ;;  %v2280_v29 = vpop.f32.mrb[13].mxu1  ;;  %v2170_v30 = vpop.f32.mrb[14].mxu0  ;;  %v1590_v27 = vld [vmem:[%s2878_s13 + $0x60] sm:$0xff] }
 0x11e   : > { %2119 = vst [vmem:[%s2891_s26 + $0x10] sm:$0xff] %v2051_v24   ;;  %1679 = vst [vmem:[%s2887_s24 + $0x28] sm:$0xff] %v1647_v25  ;;  %v2281_v31 = vadd.f32 %v2280_v29, %v2279_v26  ;;  %v2282_v32 = vpop.f32.mrb[14].mxu1  ;;  %v2171_v33 = vpop.f32.mrb[15].mxu0 }
 0x11f   : > { %v2172_v35 = vadd.f32 %v2171_v33, %v2170_v30  ;;  %v2283_v36 = vpop.f32.mrb[15].mxu1 }
 0x120   : > { %v1217_v37 = vadd.f32 %v2281_v31, %v2169_v28  ;;  %v2284_v38 = vadd.f32 %v2283_v36, %v2282_v32  ;;  %v1591_v32 = vld [vmem:[%s2878_s13 + $0x68] sm:$0xff] }
 0x122   : > { %v1648_v40 = vadd.f32 %v1584_v34, %v1217_v37  ;;  %v1220_v41 = vadd.f32 %v2284_v38, %v2172_v35 }
 0x123   : > { %v2173_v42 = vpop.f32.mrb[16].mxu0 }
 0x124   : > { %1680 = vst [vmem:[%s2887_s24 + $0x30] sm:$0xff] %v1648_v40  ;;  %v2056_v43 = vpack.c.bf16 %v1220_v41, %v1217_v37  ;;  %v1649_v44 = vadd.f32 %v1585_v39, %v1220_v41  ;;  %v2285_v45 = vpop.f32.mrb[16].mxu1  ;;  %v2174_v46 = vpop.f32.mrb[17].mxu0 }
 0x125   : > { %v2175_v47 = vadd.f32 %v2174_v46, %v2173_v42  ;;  %v2286_v48 = vpop.f32.mrb[17].mxu1  ;;  %v2176_v49 = vpop.f32.mrb[18].mxu0  ;;  %v1592_v46 = vld [vmem:[%s2878_s13 + $0x70] sm:$0xff] }
 0x126   : > { %2120 = vst [vmem:[%s2891_s26 + $0x18] sm:$0xff] %v2056_v43   ;;  %1681 = vst [vmem:[%s2887_s24 + $0x38] sm:$0xff] %v1649_v44  ;;  %v2287_v50 = vadd.f32 %v2286_v48, %v2285_v45  ;;  %v2288_v51 = vpop.f32.mrb[18].mxu1  ;;  %v2177_v52 = vpop.f32.mrb[19].mxu0 }
 0x127   : > { %v2178_v54 = vadd.f32 %v2177_v52, %v2176_v49  ;;  %v2289_v55 = vpop.f32.mrb[19].mxu1 }
 0x128   : > { %v1225_v56 = vadd.f32 %v2287_v50, %v2175_v47  ;;  %v2290_v57 = vadd.f32 %v2289_v55, %v2288_v51  ;;  %v1593_v51 = vld [vmem:[%s2878_s13 + $0x78] sm:$0xff] }
 0x12a   : > { %v1650_v59 = vadd.f32 %v1586_v53, %v1225_v56  ;;  %v1228_v60 = vadd.f32 %v2290_v57, %v2178_v54 }
 0x12b   : > { %v2179_v61 = vpop.f32.mrb[20].mxu0 }
 0x12c   : > { %1682 = vst [vmem:[%s2887_s24 + $0x40] sm:$0xff] %v1650_v59  ;;  %v2061_v62 = vpack.c.bf16 %v1228_v60, %v1225_v56  ;;  %v1651_v63 = vadd.f32 %v1587_v58, %v1228_v60  ;;  %v2291_v0 = vpop.f32.mrb[20].mxu1  ;;  %v2180_v1 = vpop.f32.mrb[21].mxu0 }
 0x12d   : > { %v2181_v2 = vadd.f32 %v2180_v1, %v2179_v61  ;;  %v2292_v3 = vpop.f32.mrb[21].mxu1  ;;  %v2182_v4 = vpop.f32.mrb[22].mxu0  ;;  %v1594_v1 = vld [vmem:[%s2878_s13 + $0x80] sm:$0xff] }
 0x12e   : > { %2121 = vst [vmem:[%s2891_s26 + $0x20] sm:$0xff] %v2061_v62   ;;  %1683 = vst [vmem:[%s2887_s24 + $0x48] sm:$0xff] %v1651_v63  ;;  %v2293_v5 = vadd.f32 %v2292_v3, %v2291_v0  ;;  %v2294_v6 = vpop.f32.mrb[22].mxu1  ;;  %v2183_v7 = vpop.f32.mrb[23].mxu0 }
 0x12f   : > { %v2184_v9 = vadd.f32 %v2183_v7, %v2182_v4  ;;  %v2295_v10 = vpop.f32.mrb[23].mxu1 }
 0x130   : > { %v1233_v11 = vadd.f32 %v2293_v5, %v2181_v2  ;;  %v2296_v12 = vadd.f32 %v2295_v10, %v2294_v6  ;;  %v1595_v6 = vld [vmem:[%s2878_s13 + $0x88] sm:$0xff] }
 0x132   : > { %v1652_v14 = vadd.f32 %v1588_v8, %v1233_v11  ;;  %v1236_v15 = vadd.f32 %v2296_v12, %v2184_v9 }
 0x133   : > { %v2185_v16 = vpop.f32.mrb[24].mxu0 }
 0x134   : > { %1684 = vst [vmem:[%s2887_s24 + $0x50] sm:$0xff] %v1652_v14  ;;  %v2066_v17 = vpack.c.bf16 %v1236_v15, %v1233_v11  ;;  %v1653_v18 = vadd.f32 %v1589_v13, %v1236_v15  ;;  %v2297_v19 = vpop.f32.mrb[24].mxu1  ;;  %v2186_v20 = vpop.f32.mrb[25].mxu0 }
 0x135   : > { %v2187_v21 = vadd.f32 %v2186_v20, %v2185_v16  ;;  %v2298_v22 = vpop.f32.mrb[25].mxu1  ;;  %v2188_v23 = vpop.f32.mrb[26].mxu0  ;;  %v1596_v20 = vld [vmem:[%s2878_s13 + $0x90] sm:$0xff] }
 0x136   : > { %2122 = vst [vmem:[%s2891_s26 + $0x28] sm:$0xff] %v2066_v17   ;;  %1685 = vst [vmem:[%s2887_s24 + $0x58] sm:$0xff] %v1653_v18  ;;  %v2299_v24 = vadd.f32 %v2298_v22, %v2297_v19  ;;  %v2300_v25 = vpop.f32.mrb[26].mxu1  ;;  %v2189_v26 = vpop.f32.mrb[27].mxu0 }
 0x137   : > { %v2190_v28 = vadd.f32 %v2189_v26, %v2188_v23  ;;  %v2301_v29 = vpop.f32.mrb[27].mxu1 }
 0x138   : > { %v1241_v30 = vadd.f32 %v2299_v24, %v2187_v21  ;;  %v2302_v31 = vadd.f32 %v2301_v29, %v2300_v25  ;;  %v1597_v25 = vld [vmem:[%s2878_s13 + $0x98] sm:$0xff] }
 0x13a   : > { %v1654_v33 = vadd.f32 %v1590_v27, %v1241_v30  ;;  %v1244_v34 = vadd.f32 %v2302_v31, %v2190_v28 }
 0x13b   : > { %v2191_v35 = vpop.f32.mrb[28].mxu0 }
 0x13c   : > { %1686 = vst [vmem:[%s2887_s24 + $0x60] sm:$0xff] %v1654_v33  ;;  %v2071_v36 = vpack.c.bf16 %v1244_v34, %v1241_v30  ;;  %v1655_v37 = vadd.f32 %v1591_v32, %v1244_v34  ;;  %v2303_v38 = vpop.f32.mrb[28].mxu1  ;;  %v2192_v39 = vpop.f32.mrb[29].mxu0 }
 0x13d   : > { %v2193_v40 = vadd.f32 %v2192_v39, %v2191_v35  ;;  %v2304_v41 = vpop.f32.mrb[29].mxu1  ;;  %v2194_v42 = vpop.f32.mrb[30].mxu0  ;;  %v1598_v39 = vld [vmem:[%s2878_s13 + $0xa0] sm:$0xff] }
 0x13e   : > { %2123 = vst [vmem:[%s2891_s26 + $0x30] sm:$0xff] %v2071_v36   ;;  %1687 = vst [vmem:[%s2887_s24 + $0x68] sm:$0xff] %v1655_v37  ;;  %v2305_v43 = vadd.f32 %v2304_v41, %v2303_v38  ;;  %v2306_v44 = vpop.f32.mrb[30].mxu1  ;;  %v2195_v45 = vpop.f32.mrb[31].mxu0 }
 0x13f   : > { %v2196_v47 = vadd.f32 %v2195_v45, %v2194_v42  ;;  %v2307_v48 = vpop.f32.mrb[31].mxu1 }
 0x140   : > { %v1249_v49 = vadd.f32 %v2305_v43, %v2193_v40  ;;  %v2308_v50 = vadd.f32 %v2307_v48, %v2306_v44  ;;  %v1599_v44 = vld [vmem:[%s2878_s13 + $0xa8] sm:$0xff] }
 0x142   : > { %v1656_v52 = vadd.f32 %v1592_v46, %v1249_v49  ;;  %v1252_v53 = vadd.f32 %v2308_v50, %v2196_v47 }
 0x143   : > { %v2197_v54 = vpop.f32.mrb[32].mxu0 }
 0x144   : > { %1688 = vst [vmem:[%s2887_s24 + $0x70] sm:$0xff] %v1656_v52  ;;  %v2076_v55 = vpack.c.bf16 %v1252_v53, %v1249_v49  ;;  %v1657_v56 = vadd.f32 %v1593_v51, %v1252_v53  ;;  %v2309_v57 = vpop.f32.mrb[32].mxu1  ;;  %v2198_v58 = vpop.f32.mrb[33].mxu0 }
 0x145   : > { %v2199_v59 = vadd.f32 %v2198_v58, %v2197_v54  ;;  %v2310_v60 = vpop.f32.mrb[33].mxu1  ;;  %v2200_v61 = vpop.f32.mrb[34].mxu0  ;;  %v1600_v58 = vld [vmem:[%s2878_s13 + $0xb0] sm:$0xff] }
 0x146   : > { %2124 = vst [vmem:[%s2891_s26 + $0x38] sm:$0xff] %v2076_v55   ;;  %1689 = vst [vmem:[%s2887_s24 + $0x78] sm:$0xff] %v1657_v56  ;;  %v2311_v62 = vadd.f32 %v2310_v60, %v2309_v57  ;;  %v2312_v63 = vpop.f32.mrb[34].mxu1  ;;  %v2201_v0 = vpop.f32.mrb[35].mxu0 }
 0x147   : > { %v2202_v2 = vadd.f32 %v2201_v0, %v2200_v61  ;;  %v2313_v3 = vpop.f32.mrb[35].mxu1 }
 0x148   : > { %v1257_v4 = vadd.f32 %v2311_v62, %v2199_v59  ;;  %v2314_v5 = vadd.f32 %v2313_v3, %v2312_v63  ;;  %v1601_v63 = vld [vmem:[%s2878_s13 + $0xb8] sm:$0xff] }
 0x14a   : > { %v1658_v7 = vadd.f32 %v1594_v1, %v1257_v4  ;;  %v1260_v8 = vadd.f32 %v2314_v5, %v2202_v2 }
 0x14b   : > { %v2203_v9 = vpop.f32.mrb[36].mxu0 }
 0x14c   : > { %1690 = vst [vmem:[%s2887_s24 + $0x80] sm:$0xff] %v1658_v7  ;;  %v2081_v10 = vpack.c.bf16 %v1260_v8, %v1257_v4  ;;  %v1659_v11 = vadd.f32 %v1595_v6, %v1260_v8  ;;  %v2315_v12 = vpop.f32.mrb[36].mxu1  ;;  %v2204_v13 = vpop.f32.mrb[37].mxu0 }
 0x14d   : > { %v2205_v14 = vadd.f32 %v2204_v13, %v2203_v9  ;;  %v2316_v15 = vpop.f32.mrb[37].mxu1  ;;  %v2206_v16 = vpop.f32.mrb[38].mxu0  ;;  %v1602_v13 = vld [vmem:[%s2878_s13 + $0xc0] sm:$0xff] }
 0x14e   : > { %2125 = vst [vmem:[%s2891_s26 + $0x40] sm:$0xff] %v2081_v10   ;;  %1691 = vst [vmem:[%s2887_s24 + $0x88] sm:$0xff] %v1659_v11  ;;  %v2317_v17 = vadd.f32 %v2316_v15, %v2315_v12  ;;  %v2318_v18 = vpop.f32.mrb[38].mxu1  ;;  %v2207_v19 = vpop.f32.mrb[39].mxu0 }
 0x14f   : > { %v2208_v21 = vadd.f32 %v2207_v19, %v2206_v16  ;;  %v2319_v22 = vpop.f32.mrb[39].mxu1 }
 0x150   : > { %v1265_v23 = vadd.f32 %v2317_v17, %v2205_v14  ;;  %v2320_v24 = vadd.f32 %v2319_v22, %v2318_v18  ;;  %v1603_v18 = vld [vmem:[%s2878_s13 + $0xc8] sm:$0xff] }
 0x152   : > { %v1660_v26 = vadd.f32 %v1596_v20, %v1265_v23  ;;  %v1268_v27 = vadd.f32 %v2320_v24, %v2208_v21 }
 0x153   : > { %v2209_v28 = vpop.f32.mrb[40].mxu0 }
 0x154   : > { %1692 = vst [vmem:[%s2887_s24 + $0x90] sm:$0xff] %v1660_v26  ;;  %v2086_v29 = vpack.c.bf16 %v1268_v27, %v1265_v23  ;;  %v1661_v30 = vadd.f32 %v1597_v25, %v1268_v27  ;;  %v2321_v31 = vpop.f32.mrb[40].mxu1  ;;  %v2210_v32 = vpop.f32.mrb[41].mxu0 }
 0x155   : > { %v2211_v33 = vadd.f32 %v2210_v32, %v2209_v28  ;;  %v2322_v34 = vpop.f32.mrb[41].mxu1  ;;  %v2212_v35 = vpop.f32.mrb[42].mxu0  ;;  %v1604_v32 = vld [vmem:[%s2878_s13 + $0xd0] sm:$0xff] }
 0x156   : > { %2126 = vst [vmem:[%s2891_s26 + $0x48] sm:$0xff] %v2086_v29   ;;  %1693 = vst [vmem:[%s2887_s24 + $0x98] sm:$0xff] %v1661_v30  ;;  %v2323_v36 = vadd.f32 %v2322_v34, %v2321_v31  ;;  %v2324_v37 = vpop.f32.mrb[42].mxu1  ;;  %v2213_v38 = vpop.f32.mrb[43].mxu0 }
 0x157   : > { %v2214_v40 = vadd.f32 %v2213_v38, %v2212_v35  ;;  %v2325_v41 = vpop.f32.mrb[43].mxu1 }
 0x158   : > { %v1273_v42 = vadd.f32 %v2323_v36, %v2211_v33  ;;  %v2326_v43 = vadd.f32 %v2325_v41, %v2324_v37  ;;  %v1605_v37 = vld [vmem:[%s2878_s13 + $0xd8] sm:$0xff] }
 0x15a   : > { %v1662_v45 = vadd.f32 %v1598_v39, %v1273_v42  ;;  %v1276_v46 = vadd.f32 %v2326_v43, %v2214_v40 }
 0x15b   : > { %v2215_v47 = vpop.f32.mrb[44].mxu0 }
 0x15c   : > { %1694 = vst [vmem:[%s2887_s24 + $0xa0] sm:$0xff] %v1662_v45  ;;  %v2091_v48 = vpack.c.bf16 %v1276_v46, %v1273_v42  ;;  %v1663_v49 = vadd.f32 %v1599_v44, %v1276_v46  ;;  %v2327_v50 = vpop.f32.mrb[44].mxu1  ;;  %v2216_v51 = vpop.f32.mrb[45].mxu0 }
 0x15d   : > { %v2217_v52 = vadd.f32 %v2216_v51, %v2215_v47  ;;  %v2328_v53 = vpop.f32.mrb[45].mxu1  ;;  %v2218_v54 = vpop.f32.mrb[46].mxu0  ;;  %v1606_v51 = vld [vmem:[%s2878_s13 + $0xe0] sm:$0xff] }
 0x15e   : > { %2127 = vst [vmem:[%s2891_s26 + $0x50] sm:$0xff] %v2091_v48   ;;  %1695 = vst [vmem:[%s2887_s24 + $0xa8] sm:$0xff] %v1663_v49  ;;  %v2329_v55 = vadd.f32 %v2328_v53, %v2327_v50  ;;  %v2330_v56 = vpop.f32.mrb[46].mxu1  ;;  %v2219_v57 = vpop.f32.mrb[47].mxu0 }
 0x15f   : > { %v2220_v59 = vadd.f32 %v2219_v57, %v2218_v54  ;;  %v2331_v60 = vpop.f32.mrb[47].mxu1 }
 0x160   : > { %v1281_v61 = vadd.f32 %v2329_v55, %v2217_v52  ;;  %v2332_v62 = vadd.f32 %v2331_v60, %v2330_v56  ;;  %v1607_v56 = vld [vmem:[%s2878_s13 + $0xe8] sm:$0xff] }
 0x162   : > { %v1664_v0 = vadd.f32 %v1600_v58, %v1281_v61  ;;  %v1284_v1 = vadd.f32 %v2332_v62, %v2220_v59 }
 0x163   : > { %v2221_v2 = vpop.f32.mrb[48].mxu0 }
 0x164   : > { %1696 = vst [vmem:[%s2887_s24 + $0xb0] sm:$0xff] %v1664_v0  ;;  %v2096_v3 = vpack.c.bf16 %v1284_v1, %v1281_v61  ;;  %v1665_v4 = vadd.f32 %v1601_v63, %v1284_v1  ;;  %v2333_v5 = vpop.f32.mrb[48].mxu1  ;;  %v2222_v6 = vpop.f32.mrb[49].mxu0 }
 0x165   : > { %v2223_v7 = vadd.f32 %v2222_v6, %v2221_v2  ;;  %v2334_v8 = vpop.f32.mrb[49].mxu1  ;;  %v2224_v9 = vpop.f32.mrb[50].mxu0  ;;  %v1608_v6 = vld [vmem:[%s2878_s13 + $0xf0] sm:$0xff] }
 0x166   : > { %2128 = vst [vmem:[%s2891_s26 + $0x58] sm:$0xff] %v2096_v3   ;;  %1697 = vst [vmem:[%s2887_s24 + $0xb8] sm:$0xff] %v1665_v4  ;;  %v2335_v10 = vadd.f32 %v2334_v8, %v2333_v5  ;;  %v2336_v11 = vpop.f32.mrb[50].mxu1  ;;  %v2225_v12 = vpop.f32.mrb[51].mxu0 }
 0x167   : > { %v2226_v14 = vadd.f32 %v2225_v12, %v2224_v9  ;;  %v2337_v15 = vpop.f32.mrb[51].mxu1 }
 0x168   : > { %v1289_v16 = vadd.f32 %v2335_v10, %v2223_v7  ;;  %v2338_v17 = vadd.f32 %v2337_v15, %v2336_v11  ;;  %v1609_v11 = vld [vmem:[%s2878_s13 + $0xf8] sm:$0xff] }
 0x16a   : > { %v1666_v19 = vadd.f32 %v1602_v13, %v1289_v16  ;;  %v1292_v20 = vadd.f32 %v2338_v17, %v2226_v14 }
 0x16b   : > { %v2227_v21 = vpop.f32.mrb[52].mxu0 }
 0x16c   : > { %1698 = vst [vmem:[%s2887_s24 + $0xc0] sm:$0xff] %v1666_v19  ;;  %v2101_v22 = vpack.c.bf16 %v1292_v20, %v1289_v16  ;;  %v1667_v23 = vadd.f32 %v1603_v18, %v1292_v20  ;;  %v2339_v24 = vpop.f32.mrb[52].mxu1  ;;  %v2228_v25 = vpop.f32.mrb[53].mxu0 }
 0x16d   : > { %v2229_v26 = vadd.f32 %v2228_v25, %v2227_v21  ;;  %v2340_v27 = vpop.f32.mrb[53].mxu1  ;;  %v2230_v28 = vpop.f32.mrb[54].mxu0 }
 0x16e   : > { %2129 = vst [vmem:[%s2891_s26 + $0x60] sm:$0xff] %v2101_v22   ;;  %1699 = vst [vmem:[%s2887_s24 + $0xc8] sm:$0xff] %v1667_v23  ;;  %v2341_v29 = vadd.f32 %v2340_v27, %v2339_v24  ;;  %v2342_v30 = vpop.f32.mrb[54].mxu1  ;;  %v2231_v31 = vpop.f32.mrb[55].mxu0 }
 0x16f   : > { %v2232_v33 = vadd.f32 %v2231_v31, %v2230_v28  ;;  %v2343_v34 = vpop.f32.mrb[55].mxu1 }
 0x170   : > { %v1297_v35 = vadd.f32 %v2341_v29, %v2229_v26  ;;  %v2344_v36 = vadd.f32 %v2343_v34, %v2342_v30 }
 0x172   : > { %v1668_v38 = vadd.f32 %v1604_v32, %v1297_v35  ;;  %v1300_v39 = vadd.f32 %v2344_v36, %v2232_v33 }
 0x173   : > { %v2233_v40 = vpop.f32.mrb[56].mxu0 }
 0x174   : > { %1700 = vst [vmem:[%s2887_s24 + $0xd0] sm:$0xff] %v1668_v38  ;;  %v2106_v41 = vpack.c.bf16 %v1300_v39, %v1297_v35  ;;  %v1669_v42 = vadd.f32 %v1605_v37, %v1300_v39  ;;  %v2345_v43 = vpop.f32.mrb[56].mxu1  ;;  %v2234_v44 = vpop.f32.mrb[57].mxu0 }
 0x175   : > { %v2235_v45 = vadd.f32 %v2234_v44, %v2233_v40  ;;  %v2346_v46 = vpop.f32.mrb[57].mxu1  ;;  %v2236_v47 = vpop.f32.mrb[58].mxu0 }
 0x176   : > { %2130 = vst [vmem:[%s2891_s26 + $0x68] sm:$0xff] %v2106_v41   ;;  %1701 = vst [vmem:[%s2887_s24 + $0xd8] sm:$0xff] %v1669_v42  ;;  %v2347_v48 = vadd.f32 %v2346_v46, %v2345_v43  ;;  %v2348_v49 = vpop.f32.mrb[58].mxu1  ;;  %v2237_v50 = vpop.f32.mrb[59].mxu0 }
 0x177   : > { %v2238_v52 = vadd.f32 %v2237_v50, %v2236_v47  ;;  %v2349_v53 = vpop.f32.mrb[59].mxu1 }
 0x178   : > { %v1305_v54 = vadd.f32 %v2347_v48, %v2235_v45  ;;  %v2350_v55 = vadd.f32 %v2349_v53, %v2348_v49 }
 0x17a   : > { %v1670_v57 = vadd.f32 %v1606_v51, %v1305_v54  ;;  %v1308_v58 = vadd.f32 %v2350_v55, %v2238_v52 }
 0x17b   : > { %v2239_v59 = vpop.f32.mrb[60].mxu0 }
 0x17c   : > { %1702 = vst [vmem:[%s2887_s24 + $0xe0] sm:$0xff] %v1670_v57  ;;  %v2111_v60 = vpack.c.bf16 %v1308_v58, %v1305_v54  ;;  %v1671_v61 = vadd.f32 %v1607_v56, %v1308_v58  ;;  %v2351_v62 = vpop.f32.mrb[60].mxu1  ;;  %v2240_v63 = vpop.f32.mrb[61].mxu0 }
 0x17d   : > { %v2241_v0 = vadd.f32 %v2240_v63, %v2239_v59  ;;  %v2352_v1 = vpop.f32.mrb[61].mxu1  ;;  %v2242_v2 = vpop.f32.mrb[62].mxu0 }
 0x17e   : > { %2131 = vst [vmem:[%s2891_s26 + $0x70] sm:$0xff] %v2111_v60   ;;  %1703 = vst [vmem:[%s2887_s24 + $0xe8] sm:$0xff] %v1671_v61  ;;  %v2353_v3 = vadd.f32 %v2352_v1, %v2351_v62  ;;  %v2354_v4 = vpop.f32.mrb[62].mxu1  ;;  %v2243_v5 = vpop.f32.mrb[63].mxu0 }
 0x17f   : > { %v2244_v7 = vadd.f32 %v2243_v5, %v2242_v2  ;;  %v2355_v8 = vpop.f32.mrb[63].mxu1 }
 0x180   : > { %v1313_v9 = vadd.f32 %v2353_v3, %v2241_v0  ;;  %v2356_v10 = vadd.f32 %v2355_v8, %v2354_v4 }
 0x182   : > { %v1672_v12 = vadd.f32 %v1608_v6, %v1313_v9  ;;  %v1316_v13 = vadd.f32 %v2356_v10, %v2244_v7 }
 0x184   : > { %1704 = vst [vmem:[%s2887_s24 + $0xf0] sm:$0xff] %v1672_v12  ;;  %v2116_v14 = vpack.c.bf16 %v1316_v13, %v1313_v9  ;;  %v1673_v15 = vadd.f32 %v1609_v11, %v1316_v13 }
 0x186   : > { %2132 = vst [vmem:[%s2891_s26 + $0x78] sm:$0xff] %v2116_v14   ;;  %1705 = vst [vmem:[%s2887_s24 + $0xf8] sm:$0xff] %v1673_v15 }
 0x187   : > { %2555 = shalt.err (!%p2552_p5)
}
 0x188   : > { %s2556_s13 = scalar_lea.hbm %s2972_s8, 2048  ;;  %s2560_s21 = scalar_lea.hbm %s3030_s3, 4096 }
 0x189   : > { %p2557_p6 = scmp.ne.s32.totalorder %s2972_s8, %s2556_s13  ;;  %p2561_p10 = scmp.lt.u32.totalorder %s2972_s8, %s3030_s3 }
 0x18a   : > { %p2562_p11 = scmp.lt.u32.totalorder %s2560_s21, %s2556_s13  ;;  %p2564_p13 = scmp.lt.u32.totalorder %s2556_s13, %s2972_s8 }
 0x18b   : > { %p2558_p7 = pnand %p2557_p6, %p2690_p4 }
 0x18c   : > { %p2563_p12 = por %p2562_p11, %p2561_p10 }
 0x18d   : > { %p2559_p9 = pneg %p2558_p7 }
 0x18e   : > { %p2565_p0 = por %p2564_p13, %p2563_p12 }
 0x190   : > { %p2566_p1 = pnand %p2565_p0, %p2559_p9 }
 0x192   : > { %2569 = shalt.err (!%p2566_p1)
}
 0x193   : > { %s2623_s26 = smov 64   ;;  %s2624_s30 = smov 4  }
 0x194   : > { %2357 = dma.vmem_to_hbm [thread:$0]  (%p2690_p4), %s2974_s5, 2048, %s2972_s8, %s2981_s18, %s2623_s26, %s2623_s26, %s2624_s30  }
 0x195 PF: > { %p2363_p2 = scmp.ge.s32.totalorder %s2620_s20, 2  ;;  %s1744_s6 = sand.u32 1, %s2600_s15  }
 0x196   : > { %s1745_s7 = scalar_lea.sflag [#allocation4], %s1744_s6 }
 0x197   : > { %p2360_p3 = pnand %p2363_p2, %p2697_p8 }
 0x199   : > { %2595 = dma.done.wait (!%p2360_p3), %s1745_s7, 2048  }
 0x19a   : > { %2597 = vsyncadd (!%p2360_p3), %s1745_s7, 4294965248  ;;  %s18_s20 = sadd.s32 1, %s2620_s20   ;;  %s3034_s15 = smov %s2604_s16 }
 0x19b   : > { %p15_p5 = scmp.ge.s32.totalorder %s18_s20, 4   ;;  %s3035_s16 = smov %s2608_s17 }
 0x19c   : > { %s3036_s17 = smov %s2703_s28  ;;  %s3037_s18 = smov %s2616_s19 }
 0x19d   : > { %s3038_s19 = smov %s3040_s23  ;;  %17 = sbr.rel (!%p15_p5) target bundleno = 4 (0x4), region = 93 }
 0x1a4   :  { %1758 = vsyncpa [#allocation4], 1 }
 0x1a5   :  { %1760 = vsyncpa [#allocation4 + $0x1], 1 }

// kernel: lightgcn_forward.7
= control target key start
LH: loop header
LB: loop body
LE: loop exit
PB: predicated region body
PF: predicated region fallthrough
CT: control target
= control target key end

     0   :  { %s2024_s1 = inlined_call_operand.vmem [shape: bf16[512,128], index: 1, kind: input, shape index: {}]   ;;  %s2025_s0 = inlined_call_operand.vmem [shape: bf16[256,512], index: 0, kind: input, shape index: {}]   ;;  %s2026_s2 = inlined_call_operand.vmem [shape: f32[256,128], index: 2, kind: output, shape index: {}]  }
   0x1   :  { %v1497_v0 = vld [vmem:[%s2024_s1 + $0x40] sm:$0xff]   ;;  %v1501_v4 = vld [vmem:[%s2024_s1 + $0x48] sm:$0xff]   ;;  %v1505_v8 = vld [vmem:[%s2024_s1 + $0x50] sm:$0xff]  }
   0x2   :  { %v1498_v1 = vld [vmem:[%s2024_s1 + $0xc0] sm:$0xff]   ;;  %1273 = vmatprep.subr.bf16.mxu0 %v1497_v0  ;;  %v1502_v5 = vld [vmem:[%s2024_s1 + $0xc8] sm:$0xff]   ;;  %v1506_v9 = vld [vmem:[%s2024_s1 + $0xd0] sm:$0xff]  }
   0x3   :  { %v1499_v2 = vld [vmem:[%s2024_s1] sm:$0xff]   ;;  %1385 = vmatprep.subr.bf16.mxu1 %v1498_v1  ;;  %v1503_v6 = vld [vmem:[%s2024_s1 + $0x8] sm:$0xff]   ;;  %v1507_v10 = vld [vmem:[%s2024_s1 + $0x10] sm:$0xff]  }
   0x4   :  { %v1500_v3 = vld [vmem:[%s2024_s1 + $0x80] sm:$0xff]   ;;  %1274 = vmatpush3.bf16.msra.mxu0 %v1499_v2  ;;  %v1504_v7 = vld [vmem:[%s2024_s1 + $0x88] sm:$0xff]   ;;  %v1508_v11 = vld [vmem:[%s2024_s1 + $0x90] sm:$0xff]  }
   0x5   :  { %1386 = vmatpush3.bf16.msra.mxu1 %v1500_v3  ;;  %1275 = vmatprep.subr.bf16.mxu0 %v1501_v4  ;;  %v1509_v12 = vld [vmem:[%s2024_s1 + $0x58] sm:$0xff]   ;;  %v1513_v16 = vld [vmem:[%s2024_s1 + $0x60] sm:$0xff]   ;;  %v1517_v20 = vld [vmem:[%s2024_s1 + $0x68] sm:$0xff]  }
   0x6   :  { %1387 = vmatprep.subr.bf16.mxu1 %v1502_v5  ;;  %v1510_v13 = vld [vmem:[%s2024_s1 + $0xd8] sm:$0xff]   ;;  %v1514_v17 = vld [vmem:[%s2024_s1 + $0xe0] sm:$0xff]   ;;  %v1518_v21 = vld [vmem:[%s2024_s1 + $0xe8] sm:$0xff]  }
   0x7   :  { %v1511_v14 = vld [vmem:[%s2024_s1 + $0x18] sm:$0xff]   ;;  %v1515_v18 = vld [vmem:[%s2024_s1 + $0x20] sm:$0xff]   ;;  %v1519_v22 = vld [vmem:[%s2024_s1 + $0x28] sm:$0xff]  }
   0x8   :  { %1276 = vmatpush3.bf16.msra.mxu0 %v1503_v6  ;;  %v1512_v15 = vld [vmem:[%s2024_s1 + $0x98] sm:$0xff]   ;;  %v1516_v19 = vld [vmem:[%s2024_s1 + $0xa0] sm:$0xff]   ;;  %v1520_v23 = vld [vmem:[%s2024_s1 + $0xa8] sm:$0xff]  }
   0x9   :  { %1388 = vmatpush3.bf16.msra.mxu1 %v1504_v7  ;;  %1277 = vmatprep.subr.bf16.mxu0 %v1505_v8  ;;  %v1521_v24 = vld [vmem:[%s2024_s1 + $0x70] sm:$0xff]   ;;  %v1525_v28 = vld [vmem:[%s2024_s1 + $0x78] sm:$0xff]  }
   0xa   :  { %1389 = vmatprep.subr.bf16.mxu1 %v1506_v9  ;;  %v1522_v25 = vld [vmem:[%s2024_s1 + $0xf0] sm:$0xff]   ;;  %v1526_v29 = vld [vmem:[%s2024_s1 + $0xf8] sm:$0xff]  }
   0xb   :  { %v1523_v26 = vld [vmem:[%s2024_s1 + $0x30] sm:$0xff]   ;;  %v1527_v30 = vld [vmem:[%s2024_s1 + $0x38] sm:$0xff]  }
   0xc   :  { %1278 = vmatpush3.bf16.msra.mxu0 %v1507_v10  ;;  %v1524_v27 = vld [vmem:[%s2024_s1 + $0xb0] sm:$0xff]   ;;  %v1528_v31 = vld [vmem:[%s2024_s1 + $0xb8] sm:$0xff]  }
   0xd   :  { %1390 = vmatpush3.bf16.msra.mxu1 %v1508_v11  ;;  %1279 = vmatprep.subr.bf16.mxu0 %v1509_v12  ;;  %v1529_v32 = vld [vmem:[%s2025_s0] ss:$16 sps:$4 sm:$0xff]   ;;  %v1531_v33 = vld [vmem:[%s2025_s0 + $0x4] ss:$16 sps:$4 sm:$0xff]   ;;  %v1532_v34 = vld [vmem:[%s2025_s0 + $0x8] ss:$16 sps:$4 sm:$0xff]  }
   0xe   :  { %1391 = vmatprep.subr.bf16.mxu1 %v1510_v13  ;;  %v1534_v35 = vld [vmem:[%s2025_s0 + $0xc] ss:$16 sps:$4 sm:$0xff]   ;;  %752 = vmatprep.mubr.bf16.mxu0 %v1531_v33  ;;  %v1535_v36 = vld [vmem:[%s2025_s0 + $0x24] ss:$16 sps:$4 sm:$0xff]   ;;  %v1539_v38 = vld [vmem:[%s2025_s0 + $0x20] ss:$16 sps:$4 sm:$0xff]  }
   0xf   :  { %913 = vmatprep.mubr.bf16.mxu1 %v1534_v35  ;;  %v1537_v37 = vld [vmem:[%s2025_s0 + $0x2c] ss:$16 sps:$4 sm:$0xff]   ;;  %v1540_v39 = vld [vmem:[%s2025_s0 + $0x28] ss:$16 sps:$4 sm:$0xff]   ;;  %v1541_v40 = vld [vmem:[%s2025_s0 + $0x44] ss:$16 sps:$4 sm:$0xff]  }
  0x10   :  { %1280 = vmatpush3.bf16.msra.mxu0 %v1511_v14  ;;  %v1543_v41 = vld [vmem:[%s2025_s0 + $0x4c] ss:$16 sps:$4 sm:$0xff]   ;;  %v1545_v42 = vld [vmem:[%s2025_s0 + $0x40] ss:$16 sps:$4 sm:$0xff]   ;;  %v1546_v43 = vld [vmem:[%s2025_s0 + $0x48] ss:$16 sps:$4 sm:$0xff]  }
  0x11   :  { %1392 = vmatpush3.bf16.msra.mxu1 %v1512_v15  ;;  %1281 = vmatprep.subr.bf16.mxu0 %v1513_v16  ;;  %v1547_v44 = vld [vmem:[%s2025_s0 + $0x64] ss:$16 sps:$4 sm:$0xff]   ;;  %v1549_v45 = vld [vmem:[%s2025_s0 + $0x6c] ss:$16 sps:$4 sm:$0xff]   ;;  %v1551_v46 = vld [vmem:[%s2025_s0 + $0x60] ss:$16 sps:$4 sm:$0xff]  }
  0x12   :  { %1393 = vmatprep.subr.bf16.mxu1 %v1514_v17  ;;  %v1552_v47 = vld [vmem:[%s2025_s0 + $0x68] ss:$16 sps:$4 sm:$0xff]   ;;  %v1553_v48 = vld [vmem:[%s2025_s0 + $0x84] ss:$16 sps:$4 sm:$0xff]   ;;  %v1555_v49 = vld [vmem:[%s2025_s0 + $0x8c] ss:$16 sps:$4 sm:$0xff]  }
  0x13   :  { %v1557_v50 = vld [vmem:[%s2025_s0 + $0x80] ss:$16 sps:$4 sm:$0xff]   ;;  %v1558_v51 = vld [vmem:[%s2025_s0 + $0x88] ss:$16 sps:$4 sm:$0xff]   ;;  %v1559_v52 = vld [vmem:[%s2025_s0 + $0xa4] ss:$16 sps:$4 sm:$0xff]  }
  0x14   :  { %1282 = vmatpush3.bf16.msra.mxu0 %v1515_v18  ;;  %v1561_v53 = vld [vmem:[%s2025_s0 + $0xac] ss:$16 sps:$4 sm:$0xff]   ;;  %v1563_v54 = vld [vmem:[%s2025_s0 + $0xa0] ss:$16 sps:$4 sm:$0xff]   ;;  %v1564_v55 = vld [vmem:[%s2025_s0 + $0xa8] ss:$16 sps:$4 sm:$0xff]  }
  0x15   :  { %1394 = vmatpush3.bf16.msra.mxu1 %v1516_v19  ;;  %1283 = vmatprep.subr.bf16.mxu0 %v1517_v20  ;;  %v1565_v56 = vld [vmem:[%s2025_s0 + $0xc4] ss:$16 sps:$4 sm:$0xff]   ;;  %v1567_v57 = vld [vmem:[%s2025_s0 + $0xcc] ss:$16 sps:$4 sm:$0xff]   ;;  %v1569_v58 = vld [vmem:[%s2025_s0 + $0xc0] ss:$16 sps:$4 sm:$0xff]  }
  0x16   :  { %1395 = vmatprep.subr.bf16.mxu1 %v1518_v21  ;;  %v1570_v59 = vld [vmem:[%s2025_s0 + $0xc8] ss:$16 sps:$4 sm:$0xff]   ;;  %v1571_v60 = vld [vmem:[%s2025_s0 + $0xe4] ss:$16 sps:$4 sm:$0xff]   ;;  %v1573_v61 = vld [vmem:[%s2025_s0 + $0xec] ss:$16 sps:$4 sm:$0xff]  }
  0x17   :  { %v1575_v62 = vld [vmem:[%s2025_s0 + $0xe0] ss:$16 sps:$4 sm:$0xff]   ;;  %v1576_v63 = vld [vmem:[%s2025_s0 + $0xe8] ss:$16 sps:$4 sm:$0xff]   ;;  %v1577_v0 = vld [vmem:[%s2025_s0 + $0x104] ss:$16 sps:$4 sm:$0xff]  }
  0x18   :  { %1284 = vmatpush3.bf16.msra.mxu0 %v1519_v22  ;;  %v1579_v1 = vld [vmem:[%s2025_s0 + $0x10c] ss:$16 sps:$4 sm:$0xff]   ;;  %v1581_v2 = vld [vmem:[%s2025_s0 + $0x100] ss:$16 sps:$4 sm:$0xff]   ;;  %v1582_v3 = vld [vmem:[%s2025_s0 + $0x108] ss:$16 sps:$4 sm:$0xff]  }
  0x19   :  { %1396 = vmatpush3.bf16.msra.mxu1 %v1520_v23  ;;  %1285 = vmatprep.subr.bf16.mxu0 %v1521_v24  ;;  %v1583_v4 = vld [vmem:[%s2025_s0 + $0x124] ss:$16 sps:$4 sm:$0xff]   ;;  %v1585_v5 = vld [vmem:[%s2025_s0 + $0x12c] ss:$16 sps:$4 sm:$0xff]   ;;  %v1587_v6 = vld [vmem:[%s2025_s0 + $0x120] ss:$16 sps:$4 sm:$0xff]  }
  0x1a   :  { %1397 = vmatprep.subr.bf16.mxu1 %v1522_v25  ;;  %v1588_v7 = vld [vmem:[%s2025_s0 + $0x128] ss:$16 sps:$4 sm:$0xff]   ;;  %v1589_v8 = vld [vmem:[%s2025_s0 + $0x144] ss:$16 sps:$4 sm:$0xff]   ;;  %v1591_v9 = vld [vmem:[%s2025_s0 + $0x14c] ss:$16 sps:$4 sm:$0xff]  }
  0x1b   :  { %v1593_v10 = vld [vmem:[%s2025_s0 + $0x140] ss:$16 sps:$4 sm:$0xff]   ;;  %v1594_v11 = vld [vmem:[%s2025_s0 + $0x148] ss:$16 sps:$4 sm:$0xff]   ;;  %v1595_v12 = vld [vmem:[%s2025_s0 + $0x164] ss:$16 sps:$4 sm:$0xff]  }
  0x1c   :  { %1286 = vmatpush3.bf16.msra.mxu0 %v1523_v26  ;;  %v1597_v13 = vld [vmem:[%s2025_s0 + $0x16c] ss:$16 sps:$4 sm:$0xff]   ;;  %v1599_v14 = vld [vmem:[%s2025_s0 + $0x160] ss:$16 sps:$4 sm:$0xff]   ;;  %v1600_v15 = vld [vmem:[%s2025_s0 + $0x168] ss:$16 sps:$4 sm:$0xff]  }
  0x1d   :  { %1398 = vmatpush3.bf16.msra.mxu1 %v1524_v27  ;;  %1287 = vmatprep.subr.bf16.mxu0 %v1525_v28  ;;  %v1601_v16 = vld [vmem:[%s2025_s0 + $0x184] ss:$16 sps:$4 sm:$0xff]   ;;  %v1603_v17 = vld [vmem:[%s2025_s0 + $0x18c] ss:$16 sps:$4 sm:$0xff]   ;;  %v1605_v18 = vld [vmem:[%s2025_s0 + $0x180] ss:$16 sps:$4 sm:$0xff]  }
  0x1e   :  { %1399 = vmatprep.subr.bf16.mxu1 %v1526_v29  ;;  %v1606_v19 = vld [vmem:[%s2025_s0 + $0x188] ss:$16 sps:$4 sm:$0xff]   ;;  %v1607_v20 = vld [vmem:[%s2025_s0 + $0x1a4] ss:$16 sps:$4 sm:$0xff]   ;;  %v1609_v21 = vld [vmem:[%s2025_s0 + $0x1ac] ss:$16 sps:$4 sm:$0xff]  }
  0x1f   :  { %v1611_v22 = vld [vmem:[%s2025_s0 + $0x1a0] ss:$16 sps:$4 sm:$0xff]   ;;  %v1612_v23 = vld [vmem:[%s2025_s0 + $0x1a8] ss:$16 sps:$4 sm:$0xff]   ;;  %v1613_v24 = vld [vmem:[%s2025_s0 + $0x1c4] ss:$16 sps:$4 sm:$0xff]  }
  0x20   :  { %1288 = vmatpush3.bf16.msra.mxu0 %v1527_v30  ;;  %v1615_v25 = vld [vmem:[%s2025_s0 + $0x1cc] ss:$16 sps:$4 sm:$0xff]   ;;  %v1617_v26 = vld [vmem:[%s2025_s0 + $0x1c0] ss:$16 sps:$4 sm:$0xff]   ;;  %v1618_v27 = vld [vmem:[%s2025_s0 + $0x1c8] ss:$16 sps:$4 sm:$0xff]  }
  0x21   :  { %1400 = vmatpush3.bf16.msra.mxu1 %v1528_v31  ;;  %v1619_v28 = vld [vmem:[%s2025_s0 + $0x1e4] ss:$16 sps:$4 sm:$0xff]   ;;  %v1621_v29 = vld [vmem:[%s2025_s0 + $0x1ec] ss:$16 sps:$4 sm:$0xff]   ;;  %v1623_v30 = vld [vmem:[%s2025_s0 + $0x1e0] ss:$16 sps:$4 sm:$0xff]  }
  0x22   :  { %v1624_v31 = vld [vmem:[%s2025_s0 + $0x1e8] ss:$16 sps:$4 sm:$0xff]  }
  0x23   :  { %753 = vmatmul.mubr.bf16.vlgmr.msra.gmra.mrb[0].mxu0 %v1529_v32 }
  0x24   :  { %914 = vmatmul.mubr.bf16.vlgmr.msra.gmra.mrb[0].mxu1 %v1532_v34  ;;  %760 = vmatprep.mubr.bf16.mxu0 %v1535_v36 }
  0x25   :  { %921 = vmatprep.mubr.bf16.mxu1 %v1537_v37 }
  0x2b   :  { %761 = vmatmul.mubr.bf16.gmra.mrb[4].mxu0 %v1539_v38 }
  0x2c   :  { %922 = vmatmul.mubr.bf16.gmra.mrb[4].mxu1 %v1540_v39  ;;  %768 = vmatprep.mubr.bf16.mxu0 %v1541_v40 }
  0x2d   :  { %929 = vmatprep.mubr.bf16.mxu1 %v1543_v41 }
  0x33   :  { %769 = vmatmul.mubr.bf16.gmra.mrb[8].mxu0 %v1545_v42 }
  0x34   :  { %930 = vmatmul.mubr.bf16.gmra.mrb[8].mxu1 %v1546_v43  ;;  %776 = vmatprep.mubr.bf16.mxu0 %v1547_v44 }
  0x35   :  { %937 = vmatprep.mubr.bf16.mxu1 %v1549_v45 }
  0x3b   :  { %777 = vmatmul.mubr.bf16.gmra.mrb[12].mxu0 %v1551_v46 }
  0x3c   :  { %938 = vmatmul.mubr.bf16.gmra.mrb[12].mxu1 %v1552_v47  ;;  %784 = vmatprep.mubr.bf16.mxu0 %v1553_v48 }
  0x3d   :  { %945 = vmatprep.mubr.bf16.mxu1 %v1555_v49 }
  0x43   :  { %785 = vmatmul.mubr.bf16.gmra.mrb[16].mxu0 %v1557_v50 }
  0x44   :  { %946 = vmatmul.mubr.bf16.gmra.mrb[16].mxu1 %v1558_v51  ;;  %792 = vmatprep.mubr.bf16.mxu0 %v1559_v52 }
  0x45   :  { %953 = vmatprep.mubr.bf16.mxu1 %v1561_v53 }
  0x4b   :  { %793 = vmatmul.mubr.bf16.gmra.mrb[20].mxu0 %v1563_v54 }
  0x4c   :  { %954 = vmatmul.mubr.bf16.gmra.mrb[20].mxu1 %v1564_v55  ;;  %800 = vmatprep.mubr.bf16.mxu0 %v1565_v56 }
  0x4d   :  { %961 = vmatprep.mubr.bf16.mxu1 %v1567_v57 }
  0x53   :  { %801 = vmatmul.mubr.bf16.gmra.mrb[24].mxu0 %v1569_v58 }
  0x54   :  { %962 = vmatmul.mubr.bf16.gmra.mrb[24].mxu1 %v1570_v59  ;;  %808 = vmatprep.mubr.bf16.mxu0 %v1571_v60 }
  0x55   :  { %969 = vmatprep.mubr.bf16.mxu1 %v1573_v61 }
  0x5b   :  { %809 = vmatmul.mubr.bf16.gmra.mrb[28].mxu0 %v1575_v62 }
  0x5c   :  { %970 = vmatmul.mubr.bf16.gmra.mrb[28].mxu1 %v1576_v63  ;;  %816 = vmatprep.mubr.bf16.mxu0 %v1577_v0 }
  0x5d   :  { %977 = vmatprep.mubr.bf16.mxu1 %v1579_v1 }
  0x63   :  { %817 = vmatmul.mubr.bf16.gmra.mrb[32].mxu0 %v1581_v2 }
  0x64   :  { %978 = vmatmul.mubr.bf16.gmra.mrb[32].mxu1 %v1582_v3  ;;  %824 = vmatprep.mubr.bf16.mxu0 %v1583_v4 }
  0x65   :  { %985 = vmatprep.mubr.bf16.mxu1 %v1585_v5 }
  0x6b   :  { %825 = vmatmul.mubr.bf16.gmra.mrb[36].mxu0 %v1587_v6 }
  0x6c   :  { %986 = vmatmul.mubr.bf16.gmra.mrb[36].mxu1 %v1588_v7  ;;  %832 = vmatprep.mubr.bf16.mxu0 %v1589_v8 }
  0x6d   :  { %993 = vmatprep.mubr.bf16.mxu1 %v1591_v9 }
  0x73   :  { %833 = vmatmul.mubr.bf16.gmra.mrb[40].mxu0 %v1593_v10 }
  0x74   :  { %994 = vmatmul.mubr.bf16.gmra.mrb[40].mxu1 %v1594_v11  ;;  %840 = vmatprep.mubr.bf16.mxu0 %v1595_v12 }
  0x75   :  { %1001 = vmatprep.mubr.bf16.mxu1 %v1597_v13 }
  0x7b   :  { %841 = vmatmul.mubr.bf16.gmra.mrb[44].mxu0 %v1599_v14 }
  0x7c   :  { %1002 = vmatmul.mubr.bf16.gmra.mrb[44].mxu1 %v1600_v15  ;;  %848 = vmatprep.mubr.bf16.mxu0 %v1601_v16 }
  0x7d   :  { %1009 = vmatprep.mubr.bf16.mxu1 %v1603_v17 }
  0x83   :  { %849 = vmatmul.mubr.bf16.gmra.mrb[48].mxu0 %v1605_v18 }
  0x84   :  { %1010 = vmatmul.mubr.bf16.gmra.mrb[48].mxu1 %v1606_v19  ;;  %856 = vmatprep.mubr.bf16.mxu0 %v1607_v20 }
  0x85   :  { %1017 = vmatprep.mubr.bf16.mxu1 %v1609_v21 }
  0x8b   :  { %857 = vmatmul.mubr.bf16.gmra.mrb[52].mxu0 %v1611_v22 }
  0x8c   :  { %1018 = vmatmul.mubr.bf16.gmra.mrb[52].mxu1 %v1612_v23  ;;  %864 = vmatprep.mubr.bf16.mxu0 %v1613_v24 }
  0x8d   :  { %1025 = vmatprep.mubr.bf16.mxu1 %v1615_v25 }
  0x93   :  { %865 = vmatmul.mubr.bf16.gmra.mrb[56].mxu0 %v1617_v26 }
  0x94   :  { %1026 = vmatmul.mubr.bf16.gmra.mrb[56].mxu1 %v1618_v27  ;;  %872 = vmatprep.mubr.bf16.mxu0 %v1619_v28 }
  0x95   :  { %1033 = vmatprep.mubr.bf16.mxu1 %v1621_v29 }
  0x9b   :  { %873 = vmatmul.mubr.bf16.gmra.mrb[60].mxu0 %v1623_v30 }
  0x9c   :  { %1034 = vmatmul.mubr.bf16.gmra.mrb[60].mxu1 %v1624_v31 }
  0xf6   :  { %v1289_v32 = vpop.f32.mrb[0].mxu0 }
  0xf7   :  { %v1401_v33 = vpop.f32.mrb[0].mxu1  ;;  %v1290_v34 = vpop.f32.mrb[1].mxu0 }
  0xf8   :  { %v1291_v35 = vadd.f32 %v1290_v34, %v1289_v32  ;;  %v1402_v36 = vpop.f32.mrb[1].mxu1  ;;  %v1292_v37 = vpop.f32.mrb[2].mxu0 }
  0xf9   :  { %v1403_v38 = vadd.f32 %v1402_v36, %v1401_v33  ;;  %v1404_v39 = vpop.f32.mrb[2].mxu1  ;;  %v1293_v40 = vpop.f32.mrb[3].mxu0 }
  0xfa   :  { %v1294_v41 = vadd.f32 %v1293_v40, %v1292_v37  ;;  %v1405_v42 = vpop.f32.mrb[3].mxu1 }
  0xfb   :  { %v916_v43 = vadd.f32 %v1403_v38, %v1291_v35  ;;  %v1406_v44 = vadd.f32 %v1405_v42, %v1404_v39 }
  0xfd   :  { %1141 = vst [vmem:[%s2026_s2] sm:$0xff] %v916_v43  ;;  %v919_v45 = vadd.f32 %v1406_v44, %v1294_v41 }
  0xfe   :  { %v1295_v46 = vpop.f32.mrb[4].mxu0 }
  0xff   :  { %1142 = vst [vmem:[%s2026_s2 + $0x8] sm:$0xff] %v919_v45  ;;  %v1407_v47 = vpop.f32.mrb[4].mxu1  ;;  %v1296_v48 = vpop.f32.mrb[5].mxu0 }
 0x100   :  { %v1297_v49 = vadd.f32 %v1296_v48, %v1295_v46  ;;  %v1408_v50 = vpop.f32.mrb[5].mxu1  ;;  %v1298_v51 = vpop.f32.mrb[6].mxu0 }
 0x101   :  { %v1409_v52 = vadd.f32 %v1408_v50, %v1407_v47  ;;  %v1410_v53 = vpop.f32.mrb[6].mxu1  ;;  %v1299_v54 = vpop.f32.mrb[7].mxu0 }
 0x102   :  { %v1300_v55 = vadd.f32 %v1299_v54, %v1298_v51  ;;  %v1411_v56 = vpop.f32.mrb[7].mxu1 }
 0x103   :  { %v924_v57 = vadd.f32 %v1409_v52, %v1297_v49  ;;  %v1412_v58 = vadd.f32 %v1411_v56, %v1410_v53 }
 0x105   :  { %1143 = vst [vmem:[%s2026_s2 + $0x10] sm:$0xff] %v924_v57  ;;  %v927_v59 = vadd.f32 %v1412_v58, %v1300_v55 }
 0x106   :  { %v1301_v60 = vpop.f32.mrb[8].mxu0 }
 0x107   :  { %1144 = vst [vmem:[%s2026_s2 + $0x18] sm:$0xff] %v927_v59  ;;  %v1413_v61 = vpop.f32.mrb[8].mxu1  ;;  %v1302_v62 = vpop.f32.mrb[9].mxu0 }
 0x108   :  { %v1303_v63 = vadd.f32 %v1302_v62, %v1301_v60  ;;  %v1414_v0 = vpop.f32.mrb[9].mxu1  ;;  %v1304_v1 = vpop.f32.mrb[10].mxu0 }
 0x109   :  { %v1415_v2 = vadd.f32 %v1414_v0, %v1413_v61  ;;  %v1416_v3 = vpop.f32.mrb[10].mxu1  ;;  %v1305_v4 = vpop.f32.mrb[11].mxu0 }
 0x10a   :  { %v1306_v5 = vadd.f32 %v1305_v4, %v1304_v1  ;;  %v1417_v6 = vpop.f32.mrb[11].mxu1 }
 0x10b   :  { %v932_v7 = vadd.f32 %v1415_v2, %v1303_v63  ;;  %v1418_v8 = vadd.f32 %v1417_v6, %v1416_v3 }
 0x10d   :  { %1145 = vst [vmem:[%s2026_s2 + $0x20] sm:$0xff] %v932_v7  ;;  %v935_v9 = vadd.f32 %v1418_v8, %v1306_v5 }
 0x10e   :  { %v1307_v10 = vpop.f32.mrb[12].mxu0 }
 0x10f   :  { %1146 = vst [vmem:[%s2026_s2 + $0x28] sm:$0xff] %v935_v9  ;;  %v1419_v11 = vpop.f32.mrb[12].mxu1  ;;  %v1308_v12 = vpop.f32.mrb[13].mxu0 }
 0x110   :  { %v1309_v13 = vadd.f32 %v1308_v12, %v1307_v10  ;;  %v1420_v14 = vpop.f32.mrb[13].mxu1  ;;  %v1310_v15 = vpop.f32.mrb[14].mxu0 }
 0x111   :  { %v1421_v16 = vadd.f32 %v1420_v14, %v1419_v11  ;;  %v1422_v17 = vpop.f32.mrb[14].mxu1  ;;  %v1311_v18 = vpop.f32.mrb[15].mxu0 }
 0x112   :  { %v1312_v19 = vadd.f32 %v1311_v18, %v1310_v15  ;;  %v1423_v20 = vpop.f32.mrb[15].mxu1 }
 0x113   :  { %v940_v21 = vadd.f32 %v1421_v16, %v1309_v13  ;;  %v1424_v22 = vadd.f32 %v1423_v20, %v1422_v17 }
 0x115   :  { %1147 = vst [vmem:[%s2026_s2 + $0x30] sm:$0xff] %v940_v21  ;;  %v943_v23 = vadd.f32 %v1424_v22, %v1312_v19 }
 0x116   :  { %v1313_v24 = vpop.f32.mrb[16].mxu0 }
 0x117   :  { %1148 = vst [vmem:[%s2026_s2 + $0x38] sm:$0xff] %v943_v23  ;;  %v1425_v25 = vpop.f32.mrb[16].mxu1  ;;  %v1314_v26 = vpop.f32.mrb[17].mxu0 }
 0x118   :  { %v1315_v27 = vadd.f32 %v1314_v26, %v1313_v24  ;;  %v1426_v28 = vpop.f32.mrb[17].mxu1  ;;  %v1316_v29 = vpop.f32.mrb[18].mxu0 }
 0x119   :  { %v1427_v30 = vadd.f32 %v1426_v28, %v1425_v25  ;;  %v1428_v31 = vpop.f32.mrb[18].mxu1  ;;  %v1317_v32 = vpop.f32.mrb[19].mxu0 }
 0x11a   :  { %v1318_v33 = vadd.f32 %v1317_v32, %v1316_v29  ;;  %v1429_v34 = vpop.f32.mrb[19].mxu1 }
 0x11b   :  { %v948_v35 = vadd.f32 %v1427_v30, %v1315_v27  ;;  %v1430_v36 = vadd.f32 %v1429_v34, %v1428_v31 }
 0x11d   :  { %1149 = vst [vmem:[%s2026_s2 + $0x40] sm:$0xff] %v948_v35  ;;  %v951_v37 = vadd.f32 %v1430_v36, %v1318_v33 }
 0x11e   :  { %v1319_v38 = vpop.f32.mrb[20].mxu0 }
 0x11f   :  { %1150 = vst [vmem:[%s2026_s2 + $0x48] sm:$0xff] %v951_v37  ;;  %v1431_v39 = vpop.f32.mrb[20].mxu1  ;;  %v1320_v40 = vpop.f32.mrb[21].mxu0 }
 0x120   :  { %v1321_v41 = vadd.f32 %v1320_v40, %v1319_v38  ;;  %v1432_v42 = vpop.f32.mrb[21].mxu1  ;;  %v1322_v43 = vpop.f32.mrb[22].mxu0 }
 0x121   :  { %v1433_v44 = vadd.f32 %v1432_v42, %v1431_v39  ;;  %v1434_v45 = vpop.f32.mrb[22].mxu1  ;;  %v1323_v46 = vpop.f32.mrb[23].mxu0 }
 0x122   :  { %v1324_v47 = vadd.f32 %v1323_v46, %v1322_v43  ;;  %v1435_v48 = vpop.f32.mrb[23].mxu1 }
 0x123   :  { %v956_v49 = vadd.f32 %v1433_v44, %v1321_v41  ;;  %v1436_v50 = vadd.f32 %v1435_v48, %v1434_v45 }
 0x125   :  { %1151 = vst [vmem:[%s2026_s2 + $0x50] sm:$0xff] %v956_v49  ;;  %v959_v51 = vadd.f32 %v1436_v50, %v1324_v47 }
 0x126   :  { %v1325_v52 = vpop.f32.mrb[24].mxu0 }
 0x127   :  { %1152 = vst [vmem:[%s2026_s2 + $0x58] sm:$0xff] %v959_v51  ;;  %v1437_v53 = vpop.f32.mrb[24].mxu1  ;;  %v1326_v54 = vpop.f32.mrb[25].mxu0 }
 0x128   :  { %v1327_v55 = vadd.f32 %v1326_v54, %v1325_v52  ;;  %v1438_v56 = vpop.f32.mrb[25].mxu1  ;;  %v1328_v57 = vpop.f32.mrb[26].mxu0 }
 0x129   :  { %v1439_v58 = vadd.f32 %v1438_v56, %v1437_v53  ;;  %v1440_v59 = vpop.f32.mrb[26].mxu1  ;;  %v1329_v60 = vpop.f32.mrb[27].mxu0 }
 0x12a   :  { %v1330_v61 = vadd.f32 %v1329_v60, %v1328_v57  ;;  %v1441_v62 = vpop.f32.mrb[27].mxu1 }
 0x12b   :  { %v964_v63 = vadd.f32 %v1439_v58, %v1327_v55  ;;  %v1442_v0 = vadd.f32 %v1441_v62, %v1440_v59 }
 0x12d   :  { %1153 = vst [vmem:[%s2026_s2 + $0x60] sm:$0xff] %v964_v63  ;;  %v967_v1 = vadd.f32 %v1442_v0, %v1330_v61 }
 0x12e   :  { %v1331_v2 = vpop.f32.mrb[28].mxu0 }
 0x12f   :  { %1154 = vst [vmem:[%s2026_s2 + $0x68] sm:$0xff] %v967_v1  ;;  %v1443_v3 = vpop.f32.mrb[28].mxu1  ;;  %v1332_v4 = vpop.f32.mrb[29].mxu0 }
 0x130   :  { %v1333_v5 = vadd.f32 %v1332_v4, %v1331_v2  ;;  %v1444_v6 = vpop.f32.mrb[29].mxu1  ;;  %v1334_v7 = vpop.f32.mrb[30].mxu0 }
 0x131   :  { %v1445_v8 = vadd.f32 %v1444_v6, %v1443_v3  ;;  %v1446_v9 = vpop.f32.mrb[30].mxu1  ;;  %v1335_v10 = vpop.f32.mrb[31].mxu0 }
 0x132   :  { %v1336_v11 = vadd.f32 %v1335_v10, %v1334_v7  ;;  %v1447_v12 = vpop.f32.mrb[31].mxu1 }
 0x133   :  { %v972_v13 = vadd.f32 %v1445_v8, %v1333_v5  ;;  %v1448_v14 = vadd.f32 %v1447_v12, %v1446_v9 }
 0x135   :  { %1155 = vst [vmem:[%s2026_s2 + $0x70] sm:$0xff] %v972_v13  ;;  %v975_v15 = vadd.f32 %v1448_v14, %v1336_v11 }
 0x136   :  { %v1337_v16 = vpop.f32.mrb[32].mxu0 }
 0x137   :  { %1156 = vst [vmem:[%s2026_s2 + $0x78] sm:$0xff] %v975_v15  ;;  %v1449_v17 = vpop.f32.mrb[32].mxu1  ;;  %v1338_v18 = vpop.f32.mrb[33].mxu0 }
 0x138   :  { %v1339_v19 = vadd.f32 %v1338_v18, %v1337_v16  ;;  %v1450_v20 = vpop.f32.mrb[33].mxu1  ;;  %v1340_v21 = vpop.f32.mrb[34].mxu0 }
 0x139   :  { %v1451_v22 = vadd.f32 %v1450_v20, %v1449_v17  ;;  %v1452_v23 = vpop.f32.mrb[34].mxu1  ;;  %v1341_v24 = vpop.f32.mrb[35].mxu0 }
 0x13a   :  { %v1342_v25 = vadd.f32 %v1341_v24, %v1340_v21  ;;  %v1453_v26 = vpop.f32.mrb[35].mxu1 }
 0x13b   :  { %v980_v27 = vadd.f32 %v1451_v22, %v1339_v19  ;;  %v1454_v28 = vadd.f32 %v1453_v26, %v1452_v23 }
 0x13d   :  { %1157 = vst [vmem:[%s2026_s2 + $0x80] sm:$0xff] %v980_v27  ;;  %v983_v29 = vadd.f32 %v1454_v28, %v1342_v25 }
 0x13e   :  { %v1343_v30 = vpop.f32.mrb[36].mxu0 }
 0x13f   :  { %1158 = vst [vmem:[%s2026_s2 + $0x88] sm:$0xff] %v983_v29  ;;  %v1455_v31 = vpop.f32.mrb[36].mxu1  ;;  %v1344_v32 = vpop.f32.mrb[37].mxu0 }
 0x140   :  { %v1345_v33 = vadd.f32 %v1344_v32, %v1343_v30  ;;  %v1456_v34 = vpop.f32.mrb[37].mxu1  ;;  %v1346_v35 = vpop.f32.mrb[38].mxu0 }
 0x141   :  { %v1457_v36 = vadd.f32 %v1456_v34, %v1455_v31  ;;  %v1458_v37 = vpop.f32.mrb[38].mxu1  ;;  %v1347_v38 = vpop.f32.mrb[39].mxu0 }
 0x142   :  { %v1348_v39 = vadd.f32 %v1347_v38, %v1346_v35  ;;  %v1459_v40 = vpop.f32.mrb[39].mxu1 }
 0x143   :  { %v988_v41 = vadd.f32 %v1457_v36, %v1345_v33  ;;  %v1460_v42 = vadd.f32 %v1459_v40, %v1458_v37 }
 0x145   :  { %1159 = vst [vmem:[%s2026_s2 + $0x90] sm:$0xff] %v988_v41  ;;  %v991_v43 = vadd.f32 %v1460_v42, %v1348_v39 }
 0x146   :  { %v1349_v44 = vpop.f32.mrb[40].mxu0 }
 0x147   :  { %1160 = vst [vmem:[%s2026_s2 + $0x98] sm:$0xff] %v991_v43  ;;  %v1461_v45 = vpop.f32.mrb[40].mxu1  ;;  %v1350_v46 = vpop.f32.mrb[41].mxu0 }
 0x148   :  { %v1351_v47 = vadd.f32 %v1350_v46, %v1349_v44  ;;  %v1462_v48 = vpop.f32.mrb[41].mxu1  ;;  %v1352_v49 = vpop.f32.mrb[42].mxu0 }
 0x149   :  { %v1463_v50 = vadd.f32 %v1462_v48, %v1461_v45  ;;  %v1464_v51 = vpop.f32.mrb[42].mxu1  ;;  %v1353_v52 = vpop.f32.mrb[43].mxu0 }
 0x14a   :  { %v1354_v53 = vadd.f32 %v1353_v52, %v1352_v49  ;;  %v1465_v54 = vpop.f32.mrb[43].mxu1 }
 0x14b   :  { %v996_v55 = vadd.f32 %v1463_v50, %v1351_v47  ;;  %v1466_v56 = vadd.f32 %v1465_v54, %v1464_v51 }
 0x14d   :  { %1161 = vst [vmem:[%s2026_s2 + $0xa0] sm:$0xff] %v996_v55  ;;  %v999_v57 = vadd.f32 %v1466_v56, %v1354_v53 }
 0x14e   :  { %v1355_v58 = vpop.f32.mrb[44].mxu0 }
 0x14f   :  { %1162 = vst [vmem:[%s2026_s2 + $0xa8] sm:$0xff] %v999_v57  ;;  %v1467_v59 = vpop.f32.mrb[44].mxu1  ;;  %v1356_v60 = vpop.f32.mrb[45].mxu0 }
 0x150   :  { %v1357_v61 = vadd.f32 %v1356_v60, %v1355_v58  ;;  %v1468_v62 = vpop.f32.mrb[45].mxu1  ;;  %v1358_v63 = vpop.f32.mrb[46].mxu0 }
 0x151   :  { %v1469_v0 = vadd.f32 %v1468_v62, %v1467_v59  ;;  %v1470_v1 = vpop.f32.mrb[46].mxu1  ;;  %v1359_v2 = vpop.f32.mrb[47].mxu0 }
 0x152   :  { %v1360_v3 = vadd.f32 %v1359_v2, %v1358_v63  ;;  %v1471_v4 = vpop.f32.mrb[47].mxu1 }
 0x153   :  { %v1004_v5 = vadd.f32 %v1469_v0, %v1357_v61  ;;  %v1472_v6 = vadd.f32 %v1471_v4, %v1470_v1 }
 0x155   :  { %1163 = vst [vmem:[%s2026_s2 + $0xb0] sm:$0xff] %v1004_v5  ;;  %v1007_v7 = vadd.f32 %v1472_v6, %v1360_v3 }
 0x156   :  { %v1361_v8 = vpop.f32.mrb[48].mxu0 }
 0x157   :  { %1164 = vst [vmem:[%s2026_s2 + $0xb8] sm:$0xff] %v1007_v7  ;;  %v1473_v9 = vpop.f32.mrb[48].mxu1  ;;  %v1362_v10 = vpop.f32.mrb[49].mxu0 }
 0x158   :  { %v1363_v11 = vadd.f32 %v1362_v10, %v1361_v8  ;;  %v1474_v12 = vpop.f32.mrb[49].mxu1  ;;  %v1364_v13 = vpop.f32.mrb[50].mxu0 }
 0x159   :  { %v1475_v14 = vadd.f32 %v1474_v12, %v1473_v9  ;;  %v1476_v15 = vpop.f32.mrb[50].mxu1  ;;  %v1365_v16 = vpop.f32.mrb[51].mxu0 }
 0x15a   :  { %v1366_v17 = vadd.f32 %v1365_v16, %v1364_v13  ;;  %v1477_v18 = vpop.f32.mrb[51].mxu1 }
 0x15b   :  { %v1012_v19 = vadd.f32 %v1475_v14, %v1363_v11  ;;  %v1478_v20 = vadd.f32 %v1477_v18, %v1476_v15 }
 0x15d   :  { %1165 = vst [vmem:[%s2026_s2 + $0xc0] sm:$0xff] %v1012_v19  ;;  %v1015_v21 = vadd.f32 %v1478_v20, %v1366_v17 }
 0x15e   :  { %v1367_v22 = vpop.f32.mrb[52].mxu0 }
 0x15f   :  { %1166 = vst [vmem:[%s2026_s2 + $0xc8] sm:$0xff] %v1015_v21  ;;  %v1479_v23 = vpop.f32.mrb[52].mxu1  ;;  %v1368_v24 = vpop.f32.mrb[53].mxu0 }
 0x160   :  { %v1369_v25 = vadd.f32 %v1368_v24, %v1367_v22  ;;  %v1480_v26 = vpop.f32.mrb[53].mxu1  ;;  %v1370_v27 = vpop.f32.mrb[54].mxu0 }
 0x161   :  { %v1481_v28 = vadd.f32 %v1480_v26, %v1479_v23  ;;  %v1482_v29 = vpop.f32.mrb[54].mxu1  ;;  %v1371_v30 = vpop.f32.mrb[55].mxu0 }
 0x162   :  { %v1372_v31 = vadd.f32 %v1371_v30, %v1370_v27  ;;  %v1483_v32 = vpop.f32.mrb[55].mxu1 }
 0x163   :  { %v1020_v33 = vadd.f32 %v1481_v28, %v1369_v25  ;;  %v1484_v34 = vadd.f32 %v1483_v32, %v1482_v29 }
 0x165   :  { %1167 = vst [vmem:[%s2026_s2 + $0xd0] sm:$0xff] %v1020_v33  ;;  %v1023_v35 = vadd.f32 %v1484_v34, %v1372_v31 }
 0x166   :  { %v1373_v36 = vpop.f32.mrb[56].mxu0 }
 0x167   :  { %1168 = vst [vmem:[%s2026_s2 + $0xd8] sm:$0xff] %v1023_v35  ;;  %v1485_v37 = vpop.f32.mrb[56].mxu1  ;;  %v1374_v38 = vpop.f32.mrb[57].mxu0 }
 0x168   :  { %v1375_v39 = vadd.f32 %v1374_v38, %v1373_v36  ;;  %v1486_v40 = vpop.f32.mrb[57].mxu1  ;;  %v1376_v41 = vpop.f32.mrb[58].mxu0 }
 0x169   :  { %v1487_v42 = vadd.f32 %v1486_v40, %v1485_v37  ;;  %v1488_v43 = vpop.f32.mrb[58].mxu1  ;;  %v1377_v44 = vpop.f32.mrb[59].mxu0 }
 0x16a   :  { %v1378_v45 = vadd.f32 %v1377_v44, %v1376_v41  ;;  %v1489_v46 = vpop.f32.mrb[59].mxu1 }
 0x16b   :  { %v1028_v47 = vadd.f32 %v1487_v42, %v1375_v39  ;;  %v1490_v48 = vadd.f32 %v1489_v46, %v1488_v43 }
 0x16d   :  { %1169 = vst [vmem:[%s2026_s2 + $0xe0] sm:$0xff] %v1028_v47  ;;  %v1031_v49 = vadd.f32 %v1490_v48, %v1378_v45 }
 0x16e   :  { %v1379_v50 = vpop.f32.mrb[60].mxu0 }
 0x16f   :  { %1170 = vst [vmem:[%s2026_s2 + $0xe8] sm:$0xff] %v1031_v49  ;;  %v1491_v51 = vpop.f32.mrb[60].mxu1  ;;  %v1380_v52 = vpop.f32.mrb[61].mxu0 }
 0x170   :  { %v1381_v53 = vadd.f32 %v1380_v52, %v1379_v50  ;;  %v1492_v54 = vpop.f32.mrb[61].mxu1  ;;  %v1382_v55 = vpop.f32.mrb[62].mxu0 }
 0x171   :  { %v1493_v56 = vadd.f32 %v1492_v54, %v1491_v51  ;;  %v1494_v57 = vpop.f32.mrb[62].mxu1  ;;  %v1383_v58 = vpop.f32.mrb[63].mxu0 }
 0x172   :  { %v1384_v59 = vadd.f32 %v1383_v58, %v1382_v55  ;;  %v1495_v60 = vpop.f32.mrb[63].mxu1 }
 0x173   :  { %v1036_v61 = vadd.f32 %v1493_v56, %v1381_v53  ;;  %v1496_v62 = vadd.f32 %v1495_v60, %v1494_v57 }
 0x175   :  { %1171 = vst [vmem:[%s2026_s2 + $0xf0] sm:$0xff] %v1036_v61  ;;  %v1039_v63 = vadd.f32 %v1496_v62, %v1384_v59 }
 0x177   :  { %1172 = vst [vmem:[%s2026_s2 + $0xf8] sm:$0xff] %v1039_v63 }

</bundles_post_ra>
